<compile_context>
chip_gen: v5e
topology: v5e:2x2
jax: 0.10.0
libtpu: 0.0.40
codegen_flags: <defaults>
</compile_context>

<pallas_src>
import jax
import jax.numpy as jnp
from jax.experimental import pallas as pl
from jax.experimental.pallas import tpu as pltpu


# ----------------------------------------------------------------------------
# small in-kernel helpers
# ----------------------------------------------------------------------------
def _layernorm(x, w, b, eps=1e-6):
    mu = jnp.mean(x, axis=-1, keepdims=True)
    xc = x - mu
    var = jnp.mean(xc * xc, axis=-1, keepdims=True)
    return xc * jax.lax.rsqrt(var + eps) * w + b


def _gelu(x):
    # tanh-approximation GELU: the transcendental lands on the EUP slot.
    # TODO(synk): differs from the exact erf nn.GELU by up to ~3e-4 absolute.
    c = 0.7978845608028654  # sqrt(2/pi)
    return 0.5 * x * (1.0 + jnp.tanh(c * (x + 0.044715 * x * x * x)))


def _pick_batch_tile(B, N):
    for t in (8, 4, 2, 1):
        if B % t == 0 and t * N <= 4096:
            return t
    return 1


# ----------------------------------------------------------------------------
# parameter stacking / pre-expansion (plain JAX glue, done once per forward)
# ----------------------------------------------------------------------------
def _stack_layerscale_params(blocks, num_heads, C):
    H = num_heads
    Dh = C // H
    scale = Dh ** -0.5

    def stk(name, dtype=None):
        a = jnp.stack([blk[name] for blk in blocks], axis=0)
        return a.astype(dtype) if dtype is not None else a

    p = {
        "ln1_w": stk("ln1_w"), "ln1_b": stk("ln1_b"),
        "qkv_w": stk("qkv_w", jnp.bfloat16), "qkv_b": stk("qkv_b"),
        "proj_w": stk("proj_w", jnp.bfloat16), "proj_b": stk("proj_b"),
        "gamma1": stk("gamma1"),
        "ln2_w": stk("ln2_w"), "ln2_b": stk("ln2_b"),
        "fc1_w": stk("fc1_w", jnp.bfloat16), "fc1_b": stk("fc1_b"),
        "fc2_w": stk("fc2_w", jnp.bfloat16), "fc2_b": stk("fc2_b"),
        "gamma2": stk("gamma2"),
    }

    # Talking-heads weights, expanded to per-channel vectors.  Convention: the
    # stored (H, H) matrices are (in_head, out_head) == torch_weight.T, exactly
    # like every other linear in this file.
    #   wl_q[d, g, h*Dh + j] = scale * proj_l_w[d, h, g]   (pre-softmax mixing)
    #   ww_o[d, g, g'*Dh + j] = proj_w_w[d, g, g']         (post-softmax mixing)
    #   pwb_e[d, 0, g'*Dh + j] = proj_w_b[d, 0, g']        (post-softmax bias)
    # proj_l_b is dropped: per-head constant shift of all logits in a softmax row
    # is exactly a no-op.
    plw = jnp.stack([blk["proj_l_w"] for blk in blocks], axis=0)   # (D, H, H)
    pww = jnp.stack([blk["proj_w_w"] for blk in blocks], axis=0)   # (D, H, H)
    pwb = jnp.stack([blk["proj_w_b"] for blk in blocks], axis=0)   # (D, 1, H)
    p["wl_q"] = jnp.repeat(jnp.swapaxes(plw, 1, 2), Dh, axis=2) * scale
    p["ww_o"] = jnp.repeat(pww, Dh, axis=2)
    p["pwb_e"] = jnp.repeat(pwb, Dh, axis=2)
    return p


def _stack_classattn_params(blocks, num_heads, C):
    H = num_heads
    Dh = C // H
    scale = Dh ** -0.5

    def stk(name, dtype=None):
        a = jnp.stack([blk[name] for blk in blocks], axis=0)
        return a.astype(dtype) if dtype is not None else a

    p = {
        "ln1_w": stk("ln1_w"), "ln1_b": stk("ln1_b"),
        "q_w": stk("q_w", jnp.bfloat16), "q_b": stk("q_b"),
        "k_w": stk("k_w", jnp.bfloat16), "k_b": stk("k_b"),
        "v_w": stk("v_w", jnp.bfloat16), "v_b": stk("v_b"),
        "proj_w": stk("proj_w", jnp.bfloat16), "proj_b": stk("proj_b"),
        "gamma1": stk("gamma1"),
        "ln2_w": stk("ln2_w"), "ln2_b": stk("ln2_b"),
        "fc1_w": stk("fc1_w", jnp.bfloat16), "fc1_b": stk("fc1_b"),
        "fc2_w": stk("fc2_w", jnp.bfloat16), "fc2_b": stk("fc2_b"),
        "gamma2": stk("gamma2"),
    }
    eye = jnp.eye(H, dtype=jnp.float32)
    p["qmask"] = jnp.repeat(eye, Dh, axis=1) * scale   # (H, C) head-select * scale
    p["omask"] = jnp.repeat(eye, Dh, axis=1)           # (H, C) head-select
    return p


# ----------------------------------------------------------------------------
# fused LayerScaleBlock stack (TalkingHeadAttn + Mlp), grid = (batch_tiles, depth)
# ----------------------------------------------------------------------------
def _layerscale_blocks_fused(x, pos_embed, p, num_heads, *, batch_tile=None):
    B, N, C = x.shape
    depth = p["ln1_w"].shape[0]
    H = num_heads
    Hd = p["fc1_w"].shape[-1]
    assert N % 8 == 0, "token count must be a multiple of 8 (sublane tiling)"
    Bt = batch_tile or _pick_batch_tile(B, N)
    n_bt = B // Bt
    bf16 = jnp.bfloat16
    f32 = jnp.float32

    def kernel(x_ref, pos_ref, ln1w, ln1b, qkvw, qkvb, wlq, wwo, pwbe,
               projw, projb, g1, ln2w, ln2b, fc1w, fc1b, fc2w, fc2b, g2,
               out_ref):
        d = pl.program_id(1)

        @pl.when(d == 0)
        def _():
            out_ref[...] = x_ref[...] + pos_ref[...]

        xb = out_ref[...]                       # (Bt, N, C) f32 residual stream
        x2 = xb.reshape(Bt * N, C)

        # ---- TalkingHeadAttn --------------------------------------------------
        xn = _layernorm(x2, ln1w[0], ln1b[0])
        qkv = (jnp.dot(xn.astype(bf16), qkvw[0], preferred_element_type=f32)
               + qkvb[0])                        # (Bt*N, 3C)
        q = qkv[:, 0:C].reshape(Bt, N, C)
        k = qkv[:, C:2 * C].reshape(Bt, N, C).astype(bf16)
        v = qkv[:, 2 * C:3 * C].reshape(Bt, N, C)
        v_bf = v.astype(bf16)

        def head_body(g, acc):
            wl_g = wlq[0, pl.ds(g, 1), :]        # (1, C): scale * proj_l[:, g] expanded
            ww_g = wwo[0, pl.ds(g, 1), :]        # (1, C): proj_w[g, :] expanded
            qg = (q * wl_g).astype(bf16)
            logits = jax.lax.dot_general(        # (Bt, N, N)
                qg, k, (((2,), (2,)), ((0,), (0,))), preferred_element_type=f32)
            m = jnp.max(logits, axis=-1, keepdims=True)
            e = jnp.exp(logits - m)
            pr = e * pl.reciprocal(jnp.sum(e, axis=-1, keepdims=True), approx=True)
            pv = jax.lax.dot_general(            # (Bt, N, C)
                pr.astype(bf16), v_bf, (((2,), (1,)), ((0,), (0,))),
                preferred_element_type=f32)
            return acc + ww_g * pv

        acc = jax.lax.fori_loop(0, H, head_body, jnp.zeros((Bt, N, C), f32))
        # proj_w bias contributes  bias[g'] * sum_j v[:, j, g'-cols]
        attn_out = acc + pwbe[0] * jnp.sum(v, axis=1, keepdims=True)

        a2 = attn_out.reshape(Bt * N, C)
        a2 = (jnp.dot(a2.astype(bf16), projw[0], preferred_element_type=f32)
              + projb[0])
        x1 = x2 + g1[0] * a2                     # layer-scale residual

        # ---- MLP --------------------------------------------------------------
        xn2 = _layernorm(x1, ln2w[0], ln2b[0])
        h1 = _gelu(jnp.dot(xn2.astype(bf16), fc1w[0], preferred_element_type=f32)
                   + fc1b[0])
        y = (jnp.dot(h1.astype(bf16), fc2w[0], preferred_element_type=f32)
             + fc2b[0])
        out_ref[...] = (x1 + g2[0] * y).reshape(Bt, N, C).astype(out_ref.dtype)

    def wspec(shape):
        return pl.BlockSpec(shape, lambda bt, d, _s=len(shape): (d,) + (0,) * (_s - 1))

    return pl.pallas_call(
        kernel,
        out_shape=jax.ShapeDtypeStruct((B, N, C), x.dtype),
        grid=(n_bt, depth),
        in_specs=[
            pl.BlockSpec((Bt, N, C), lambda bt, d: (bt, 0, 0)),   # x
            pl.BlockSpec((1, N, C), lambda bt, d: (0, 0, 0)),     # pos_embed
            wspec((1, 1, C)), wspec((1, 1, C)),                   # ln1
            wspec((1, C, 3 * C)), wspec((1, 1, 3 * C)),           # qkv
            wspec((1, H, C)), wspec((1, H, C)), wspec((1, 1, C)), # wl_q, ww_o, pwb_e
            wspec((1, C, C)), wspec((1, 1, C)),                   # proj
            wspec((1, 1, C)),                                     # gamma1
            wspec((1, 1, C)), wspec((1, 1, C)),                   # ln2
            wspec((1, C, Hd)), wspec((1, 1, Hd)),                 # fc1
            wspec((1, Hd, C)), wspec((1, 1, C)),                  # fc2
            wspec((1, 1, C)),                                     # gamma2
        ],
        out_specs=pl.BlockSpec((Bt, N, C), lambda bt, d: (bt, 0, 0)),
        compiler_params=pltpu.CompilerParams(
            dimension_semantics=("parallel", "arbitrary"),
            vmem_limit_bytes=64 * 1024 * 1024),
    )(x, pos_embed,
      p["ln1_w"], p["ln1_b"], p["qkv_w"], p["qkv_b"],
      p["wl_q"], p["ww_o"], p["pwb_e"],
      p["proj_w"], p["proj_b"], p["gamma1"],
      p["ln2_w"], p["ln2_b"],
      p["fc1_w"], p["fc1_b"], p["fc2_w"], p["fc2_b"], p["gamma2"])


# ----------------------------------------------------------------------------
# fused LayerScaleBlockClassAttn stack, batched over B, grid = (depth_token_only,)
# ----------------------------------------------------------------------------
def _class_attn_blocks_fused(x, cls, p, num_heads):
    B, N, C = x.shape
    depth_t = p["ln1_w"].shape[0]
    H = num_heads
    Hd = p["fc1_w"].shape[-1]
    assert N % 8 == 0, "token count must be a multiple of 8 (sublane tiling)"
    bf16 = jnp.bfloat16
    f32 = jnp.float32

    def kernel(x_ref, cls_ref, qmask, omask,
               ln1w, ln1b, qw, qb, kw, kb, vw, vb, projw, projb, g1,
               ln2w, ln2b, fc1w, fc1b, fc2w, fc2b, g2, out_ref):
        d = pl.program_id(0)

        @pl.when(d == 0)
        def _():
            out_ref[...] = cls_ref[...]

        cls_t = out_ref[...]                     # (B, C) f32 cls stream
        xb = x_ref[...]                          # (B, N, C)
        x2 = xb.reshape(B * N, C)

        # LayerNorm(concat(cls, x)) is per-token, so normalize the parts separately
        # (avoids materializing a (B, N+1, C) concatenation).
        xn = _layernorm(x2, ln1w[0], ln1b[0])    # (B*N, C)
        cn = _layernorm(cls_t, ln1w[0], ln1b[0]) # (B, C)

        kx = (jnp.dot(xn.astype(bf16), kw[0], preferred_element_type=f32)
              + kb[0]).reshape(B, N, C)
        vx = (jnp.dot(xn.astype(bf16), vw[0], preferred_element_type=f32)
              + vb[0]).reshape(B, N, C)
        kc = jnp.dot(cn.astype(bf16), kw[0], preferred_element_type=f32) + kb[0]
        vc = jnp.dot(cn.astype(bf16), vw[0], preferred_element_type=f32) + vb[0]
        q = jnp.dot(cn.astype(bf16), qw[0], preferred_element_type=f32) + qb[0]

        kx_bf = kx.astype(bf16)
        vx_bf = vx.astype(bf16)

        def head_body(g, acc):
            qm = qmask[pl.ds(g, 1), :]           # (1, C) head-select * scale
            om = omask[pl.ds(g, 1), :]           # (1, C) head-select
            qg = q * qm                          # (B, C)
            # 2-piece online softmax over keys [cls, x_1..x_N]
            sx = jax.lax.dot_general(            # (B, 1, N)
                qg[:, None, :].astype(bf16), kx_bf,
                (((2,), (2,)), ((0,), (0,))), preferred_element_type=f32)
            sc = jnp.sum(qg * kc, axis=-1, keepdims=True)[:, :, None]   # (B,1,1)
            m = jnp.maximum(jnp.max(sx, axis=-1, keepdims=True), sc)
            ex = jnp.exp(sx - m)
            ec = jnp.exp(sc - m)
            r = pl.reciprocal(jnp.sum(ex, axis=-1, keepdims=True) + ec, approx=True)
            pv = jax.lax.dot_general(            # (B, 1, C)
                (ex * r).astype(bf16), vx_bf,
                (((2,), (1,)), ((0,), (0,))), preferred_element_type=f32)
            o = jnp.sum(pv, axis=1) + jnp.sum(ec * r, axis=1) * vc       # (B, C)
            return acc + om * o

        a = jax.lax.fori_loop(0, H, head_body, jnp.zeros((B, C), f32))
        a = jnp.dot(a.astype(bf16), projw[0], preferred_element_type=f32) + projb[0]
        c1 = cls_t + g1[0] * a

        cn2 = _layernorm(c1, ln2w[0], ln2b[0])
        h1 = _gelu(jnp.dot(cn2.astype(bf16), fc1w[0], preferred_element_type=f32)
                   + fc1b[0])
        y = jnp.dot(h1.astype(bf16), fc2w[0], preferred_element_type=f32) + fc2b[0]
        out_ref[...] = (c1 + g2[0] * y).astype(out_ref.dtype)

    def wspec(shape):
        return pl.BlockSpec(shape, lambda d, _s=len(shape): (d,) + (0,) * (_s - 1))

    return pl.pallas_call(
        kernel,
        out_shape=jax.ShapeDtypeStruct((B, C), cls.dtype),
        grid=(depth_t,),
        in_specs=[
            pl.BlockSpec((B, N, C), lambda d: (0, 0, 0)),   # x (keys/values), resident
            pl.BlockSpec((B, C), lambda d: (0, 0)),         # initial cls tokens
            pl.BlockSpec((H, C), lambda d: (0, 0)),         # qmask (scale folded in)
            pl.BlockSpec((H, C), lambda d: (0, 0)),         # omask
            wspec((1, 1, C)), wspec((1, 1, C)),             # ln1
            wspec((1, C, C)), wspec((1, 1, C)),             # q
            wspec((1, C, C)), wspec((1, 1, C)),             # k
            wspec((1, C, C)), wspec((1, 1, C)),             # v
            wspec((1, C, C)), wspec((1, 1, C)),             # proj
            wspec((1, 1, C)),                               # gamma1
            wspec((1, 1, C)), wspec((1, 1, C)),             # ln2
            wspec((1, C, Hd)), wspec((1, 1, Hd)),           # fc1
            wspec((1, Hd, C)), wspec((1, 1, C)),            # fc2
            wspec((1, 1, C)),                               # gamma2
        ],
        out_specs=pl.BlockSpec((B, C), lambda d: (0, 0)),
        compiler_params=pltpu.CompilerParams(
            dimension_semantics=("arbitrary",),
            vmem_limit_bytes=64 * 1024 * 1024),
    )(x, cls, p["qmask"], p["omask"],
      p["ln1_w"], p["ln1_b"],
      p["q_w"], p["q_b"], p["k_w"], p["k_b"], p["v_w"], p["v_b"],
      p["proj_w"], p["proj_b"], p["gamma1"],
      p["ln2_w"], p["ln2_b"],
      p["fc1_w"], p["fc1_b"], p["fc2_w"], p["fc2_b"], p["gamma2"])


# ----------------------------------------------------------------------------
# final LayerNorm + classification head on the cls token ('token' pooling)
# ----------------------------------------------------------------------------
def _head(cls2d, norm_w, norm_b, head_w, head_b):
    B, C = cls2d.shape
    nc = head_w.shape[1]
    ncp = ((nc + 127) // 128) * 128          # lane-dense output, sliced back outside
    hw = jnp.zeros((C, ncp), jnp.float32).at[:, :nc].set(head_w).astype(jnp.bfloat16)
    hb = jnp.zeros((1, ncp), jnp.float32).at[:, :nc].set(head_b)

    def kernel(x_ref, nw, nb, hw_ref, hb_ref, out_ref):
        xn = _layernorm(x_ref[...], nw[...], nb[...])
        out_ref[...] = (jnp.dot(xn.astype(jnp.bfloat16), hw_ref[...],
                                preferred_element_type=jnp.float32)
                        + hb_ref[...]).astype(out_ref.dtype)

    vmem = pl.BlockSpec(memory_space=pltpu.MemorySpace.VMEM)
    out = pl.pallas_call(
        kernel,
        out_shape=jax.ShapeDtypeStruct((B, ncp), cls2d.dtype),
        in_specs=[vmem] * 5,
        out_specs=vmem,
    )(cls2d, norm_w, norm_b, hw, hb)
    return out[:, :nc]


# ----------------------------------------------------------------------------
# full forward (matches Cait.forward with global_pool='token', eval mode)
# ----------------------------------------------------------------------------
def cait_forward(params, x, region_attn=None, num_heads=4):
    B, N, C = x.shape

    block_p = _stack_layerscale_params(params["blocks"], num_heads, C)
    # pos-embed add fused into the first depth step; pos_drop(p=0.0) is identity
    x = _layerscale_blocks_fused(x, params["pos_embed"], block_p, num_heads)

    cls = jnp.broadcast_to(params["cls_token"][:, 0, :], (B, C)).astype(x.dtype)

    if region_attn is not None:
        attn = jnp.repeat(region_attn[:, :, None], 5, axis=2).reshape(B, -1, 1)
        x = x * attn

    tok_p = _stack_classattn_params(params["blocks_token_only"], num_heads, C)
    cls = _class_attn_blocks_fused(x, cls, tok_p, num_heads)

    # final norm is per-token; 'token' pooling uses only the cls token
    return _head(cls, params["norm_w"], params["norm_b"],
                 params["head_w"], params["head_b"])


# ----------------------------------------------------------------------------
# deterministic parameter init (shapes follow the module __init__)
# Linear weights stored (in_features, out_features) == torch_weight.T; the
# talking-heads (H, H) matrices follow the same convention.
# ----------------------------------------------------------------------------
def init_params(key, *, num_patches=16, embed_dim=32, depth=2, num_heads=4,
                mlp_ratio=4.0, depth_token_only=2, mlp_ratio_token_only=4.0,
                num_classes=10, init_values=1e-4):
    C = embed_dim
    H = num_heads
    Hd = int(C * mlp_ratio)
    Hd_tok = int(C * mlp_ratio_token_only)
    keys = iter(jax.random.split(key, 256))

    def tn(shape):  # trunc_normal_(std=0.02) surrogate, deterministic
        return (0.02 * jax.random.normal(next(keys), shape)).astype(jnp.float32)

    zeros = lambda s: jnp.zeros(s, jnp.float32)
    ones = lambda s: jnp.ones(s, jnp.float32)
    ls = lambda: jnp.full((1, C), init_values, jnp.float32)

    params = {
        "pos_embed": tn((1, num_patches, C)),
        "cls_token": tn((1, 1, C)),
        "norm_w": ones((1, C)), "norm_b": zeros((1, C)),
        "head_w": tn((C, num_classes)), "head_b": zeros((1, num_classes)),
    }

    params["blocks"] = [dict(
        ln1_w=ones((1, C)), ln1_b=zeros((1, C)),
        qkv_w=tn((C, 3 * C)), qkv_b=zeros((1, 3 * C)),
        proj_l_w=tn((H, H)), proj_l_b=zeros((1, H)),   # proj_l bias: exact no-op under softmax
        proj_w_w=tn((H, H)), proj_w_b=zeros((1, H)),
        proj_w=tn((C, C)), proj_b=zeros((1, C)),
        gamma1=ls(),
        ln2_w=ones((1, C)), ln2_b=zeros((1, C)),
        fc1_w=tn((C, Hd)), fc1_b=zeros((1, Hd)),
        fc2_w=tn((Hd, C)), fc2_b=zeros((1, C)),
        gamma2=ls(),
    ) for _ in range(depth)]

    params["blocks_token_only"] = [dict(
        ln1_w=ones((1, C)), ln1_b=zeros((1, C)),
        q_w=tn((C, C)), q_b=zeros((1, C)),
        k_w=tn((C, C)), k_b=zeros((1, C)),
        v_w=tn((C, C)), v_b=zeros((1, C)),
        proj_w=tn((C, C)), proj_b=zeros((1, C)),
        gamma1=ls(),
        ln2_w=ones((1, C)), ln2_b=zeros((1, C)),
        fc1_w=tn((C, Hd_tok)), fc1_b=zeros((1, Hd_tok)),
        fc2_w=tn((Hd_tok, C)), fc2_b=zeros((1, C)),
        gamma2=ls(),
    ) for _ in range(depth_token_only)]

    return params


if __name__ == "__main__":
    key = jax.random.PRNGKey(0)
    pkey, xkey = jax.random.split(key)

    # small config: num_patches=16, embed_dim=32, depth=2, heads=4,
    # depth_token_only=2, num_classes=10
    params = init_params(pkey, num_patches=16, embed_dim=32, depth=2,
                         num_heads=4, depth_token_only=2, num_classes=10)

    # input: already-patch-embedded tokens (B, num_patches, embed_dim)
    x = jax.random.normal(xkey, (2, 16, 32), dtype=jnp.float32)

    out = cait_forward(params, x, region_attn=None, num_heads=4)
    out = jax.block_until_ready(out)

    assert out.shape == (2, 10), out.shape
    assert bool(jnp.all(jnp.isfinite(out)))
    print("KERNEL_OK")
</pallas_src>

<mosaic_0001>
module attributes {stable_mosaic.version = 11 : i64} {
  func.func @kernel(%arg0: i32, %arg1: i32, %arg2: memref<2x16x32xf32, #tpu.memory_space<vmem>>, %arg3: memref<1x16x32xf32, #tpu.memory_space<vmem>>, %arg4: memref<1x1x32xf32, #tpu.memory_space<vmem>>, %arg5: memref<1x1x32xf32, #tpu.memory_space<vmem>>, %arg6: memref<1x32x96xbf16, #tpu.memory_space<vmem>>, %arg7: memref<1x1x96xf32, #tpu.memory_space<vmem>>, %arg8: memref<1x4x32xf32, #tpu.memory_space<vmem>>, %arg9: memref<1x4x32xf32, #tpu.memory_space<vmem>>, %arg10: memref<1x1x32xf32, #tpu.memory_space<vmem>>, %arg11: memref<1x32x32xbf16, #tpu.memory_space<vmem>>, %arg12: memref<1x1x32xf32, #tpu.memory_space<vmem>>, %arg13: memref<1x1x32xf32, #tpu.memory_space<vmem>>, %arg14: memref<1x1x32xf32, #tpu.memory_space<vmem>>, %arg15: memref<1x1x32xf32, #tpu.memory_space<vmem>>, %arg16: memref<1x32x128xbf16, #tpu.memory_space<vmem>>, %arg17: memref<1x1x128xf32, #tpu.memory_space<vmem>>, %arg18: memref<1x128x32xbf16, #tpu.memory_space<vmem>>, %arg19: memref<1x1x32xf32, #tpu.memory_space<vmem>>, %arg20: memref<1x1x32xf32, #tpu.memory_space<vmem>>, %arg21: memref<2x16x32xf32, #tpu.memory_space<vmem>>) attributes {dimension_semantics = [#tpu.dimension_semantics<parallel>, #tpu.dimension_semantics<arbitrary>], iteration_bounds = array<i64: 1, 2>, scalar_prefetch = 0 : i64, scratch_operands = 0 : i64, tpu.core_type = #tpu.core_type<tc>, window_params = [{transform_indices = @transform_0, window_bounds = array<i64: 2, 16, 32>}, {pipeline_mode = #tpu.pipeline_mode<synchronous>, transform_indices = @transform_1, window_bounds = array<i64: 1, 16, 32>}, {transform_indices = @transform_2, window_bounds = array<i64: 1, 1, 32>}, {transform_indices = @transform_3, window_bounds = array<i64: 1, 1, 32>}, {transform_indices = @transform_4, window_bounds = array<i64: 1, 32, 96>}, {transform_indices = @transform_5, window_bounds = array<i64: 1, 1, 96>}, {transform_indices = @transform_6, window_bounds = array<i64: 1, 4, 32>}, {transform_indices = @transform_7, window_bounds = array<i64: 1, 4, 32>}, {transform_indices = @transform_8, window_bounds = array<i64: 1, 1, 32>}, {transform_indices = @transform_9, window_bounds = array<i64: 1, 32, 32>}, {transform_indices = @transform_10, window_bounds = array<i64: 1, 1, 32>}, {transform_indices = @transform_11, window_bounds = array<i64: 1, 1, 32>}, {transform_indices = @transform_12, window_bounds = array<i64: 1, 1, 32>}, {transform_indices = @transform_13, window_bounds = array<i64: 1, 1, 32>}, {transform_indices = @transform_14, window_bounds = array<i64: 1, 32, 128>}, {transform_indices = @transform_15, window_bounds = array<i64: 1, 1, 128>}, {transform_indices = @transform_16, window_bounds = array<i64: 1, 128, 32>}, {transform_indices = @transform_17, window_bounds = array<i64: 1, 1, 32>}, {transform_indices = @transform_18, window_bounds = array<i64: 1, 1, 32>}, {transform_indices = @transform_19, window_bounds = array<i64: 2, 16, 32>}]} {
    %c0_i32 = arith.constant 0 : i32
    %0 = arith.cmpi eq, %arg1, %c0_i32 : i32
    %1 = arith.extui %0 : i1 to i32
    %c0_i32_0 = arith.constant 0 : i32
    %2 = arith.cmpi ne, %1, %c0_i32_0 : i32
    scf.if %2 {
      %c0_72 = arith.constant 0 : index
      %c0_73 = arith.constant 0 : index
      %c0_74 = arith.constant 0 : index
      %131 = vector.load %arg2[%c0_72, %c0_73, %c0_74] : memref<2x16x32xf32, #tpu.memory_space<vmem>>, vector<2x16x32xf32>
      %c0_75 = arith.constant 0 : index
      %c0_76 = arith.constant 0 : index
      %c0_77 = arith.constant 0 : index
      %132 = vector.load %arg3[%c0_75, %c0_76, %c0_77] : memref<1x16x32xf32, #tpu.memory_space<vmem>>, vector<1x16x32xf32>
      %133 = vector.broadcast %132 : vector<1x16x32xf32> to vector<2x16x32xf32>
      %134 = arith.addf %131, %133 : vector<2x16x32xf32>
      %c0_78 = arith.constant 0 : index
      %c0_79 = arith.constant 0 : index
      %c0_80 = arith.constant 0 : index
      %135 = vector.load %arg21[%c0_78, %c0_79, %c0_80] : memref<2x16x32xf32, #tpu.memory_space<vmem>>, vector<2x16x32xf32>
      tpu.vector_store %arg21[%c0_78, %c0_79, %c0_80], %134 {strides = array<i32>} : memref<2x16x32xf32, #tpu.memory_space<vmem>>, vector<2x16x32xf32>,
    } else {
    }
    %c0 = arith.constant 0 : index
    %c0_1 = arith.constant 0 : index
    %c0_2 = arith.constant 0 : index
    %3 = vector.load %arg21[%c0, %c0_1, %c0_2] : memref<2x16x32xf32, #tpu.memory_space<vmem>>, vector<2x16x32xf32>
    %4 = vector.shape_cast %3 : vector<2x16x32xf32> to vector<32x32xf32>
    %c0_3 = arith.constant 0 : index
    %c0_4 = arith.constant 0 : index
    %c0_5 = arith.constant 0 : index
    %5 = vector.load %arg4[%c0_3, %c0_4, %c0_5] : memref<1x1x32xf32, #tpu.memory_space<vmem>>, vector<1x1x32xf32>
    %6 = vector.shape_cast %5 : vector<1x1x32xf32> to vector<1x32xf32>
    %c0_6 = arith.constant 0 : index
    %c0_7 = arith.constant 0 : index
    %c0_8 = arith.constant 0 : index
    %7 = vector.load %arg5[%c0_6, %c0_7, %c0_8] : memref<1x1x32xf32, #tpu.memory_space<vmem>>, vector<1x1x32xf32>
    %8 = vector.shape_cast %7 : vector<1x1x32xf32> to vector<1x32xf32>
    %cst = arith.constant dense<0.000000e+00> : vector<32xf32>
    %9 = vector.multi_reduction <add>, %4, %cst [1] : vector<32x32xf32> to vector<32xf32>
    %10 = vector.shape_cast %9 : vector<32xf32> to vector<32x1xf32>
    %cst_9 = arith.constant 3.200000e+01 : f32
    %11 = vector.broadcast %cst_9 : f32 to vector<32x1xf32>
    %12 = arith.divf %10, %11 : vector<32x1xf32>
    %13 = vector.broadcast %12 : vector<32x1xf32> to vector<32x32xf32>
    %14 = arith.subf %4, %13 : vector<32x32xf32>
    %15 = arith.mulf %14, %14 : vector<32x32xf32>
    %cst_10 = arith.constant dense<0.000000e+00> : vector<32xf32>
    %16 = vector.multi_reduction <add>, %15, %cst_10 [1] : vector<32x32xf32> to vector<32xf32>
    %17 = vector.shape_cast %16 : vector<32xf32> to vector<32x1xf32>
    %cst_11 = arith.constant 3.200000e+01 : f32
    %18 = vector.broadcast %cst_11 : f32 to vector<32x1xf32>
    %19 = arith.divf %17, %18 : vector<32x1xf32>
    %cst_12 = arith.constant 9.99999997E-7 : f32
    %20 = vector.broadcast %cst_12 : f32 to vector<32x1xf32>
    %21 = arith.addf %19, %20 : vector<32x1xf32>
    %22 = math.rsqrt %21 : vector<32x1xf32>
    %23 = vector.broadcast %22 : vector<32x1xf32> to vector<32x32xf32>
    %24 = arith.mulf %14, %23 : vector<32x32xf32>
    %25 = vector.broadcast %6 : vector<1x32xf32> to vector<32x32xf32>
    %26 = arith.mulf %24, %25 : vector<32x32xf32>
    %27 = vector.broadcast %8 : vector<1x32xf32> to vector<32x32xf32>
    %28 = arith.addf %26, %27 : vector<32x32xf32>
    %29 = arith.truncf %28 : vector<32x32xf32> to vector<32x32xbf16>
    %c0_13 = arith.constant 0 : index
    %c0_14 = arith.constant 0 : index
    %c0_15 = arith.constant 0 : index
    %30 = vector.load %arg6[%c0_13, %c0_14, %c0_15] : memref<1x32x96xbf16, #tpu.memory_space<vmem>>, vector<1x32x96xbf16>
    %31 = vector.shape_cast %30 : vector<1x32x96xbf16> to vector<32x96xbf16>
    %cst_16 = arith.constant dense<0.000000e+00> : vector<32x96xf32>
    %32 = tpu.matmul %29, %31, %cst_16 {dimension_numbers = #tpu.dot_dimension_numbers<[1], [0], [0], [1], [0, 0, 1, 1], [], []>} : vector<32x32xbf16>, vector<32x96xbf16>, vector<32x96xf32> -> vector<32x96xf32>
    %c0_17 = arith.constant 0 : index
    %c0_18 = arith.constant 0 : index
    %c0_19 = arith.constant 0 : index
    %33 = vector.load %arg7[%c0_17, %c0_18, %c0_19] : memref<1x1x96xf32, #tpu.memory_space<vmem>>, vector<1x1x96xf32>
    %34 = vector.shape_cast %33 : vector<1x1x96xf32> to vector<1x96xf32>
    %35 = vector.broadcast %34 : vector<1x96xf32> to vector<32x96xf32>
    %36 = arith.addf %32, %35 : vector<32x96xf32>
    %37 = vector.extract_strided_slice %36 {offsets = [0, 0], sizes = [32, 32], strides = [1, 1]} : vector<32x96xf32> to vector<32x32xf32>
    %38 = vector.shape_cast %37 : vector<32x32xf32> to vector<2x16x32xf32>
    %39 = vector.extract_strided_slice %36 {offsets = [0, 32], sizes = [32, 32], strides = [1, 1]} : vector<32x96xf32> to vector<32x32xf32>
    %40 = vector.shape_cast %39 : vector<32x32xf32> to vector<2x16x32xf32>
    %41 = arith.truncf %40 : vector<2x16x32xf32> to vector<2x16x32xbf16>
    %42 = vector.extract_strided_slice %36 {offsets = [0, 64], sizes = [32, 32], strides = [1, 1]} : vector<32x96xf32> to vector<32x32xf32>
    %43 = vector.shape_cast %42 : vector<32x32xf32> to vector<2x16x32xf32>
    %44 = arith.truncf %43 : vector<2x16x32xf32> to vector<2x16x32xbf16>
    %cst_20 = arith.constant 0.000000e+00 : f32
    %45 = vector.broadcast %cst_20 : f32 to vector<2x16x32xf32>
    %c0_i32_21 = arith.constant 0 : i32
    %c4_i32 = arith.constant 4 : i32
    %46 = arith.addi %c0_i32_21, %c4_i32 : i32
    %c1_i32 = arith.constant 1 : i32
    %47 = scf.for %arg22 = %c0_i32_21 to %46 step %c1_i32 iter_args(%arg23 = %45) -> (vector<2x16x32xf32>)  : i32 {
      %c0_72 = arith.constant 0 : index
      %131 = arith.index_cast %arg22 : i32 to index
      %c0_73 = arith.constant 0 : index
      %132 = vector.load %arg8[%c0_72, %131, %c0_73] : memref<1x4x32xf32, #tpu.memory_space<vmem>>, vector<1x1x32xf32>
      %133 = vector.shape_cast %132 : vector<1x1x32xf32> to vector<1x32xf32>
      %c0_74 = arith.constant 0 : index
      %134 = arith.index_cast %arg22 : i32 to index
      %c0_75 = arith.constant 0 : index
      %135 = vector.load %arg9[%c0_74, %134, %c0_75] : memref<1x4x32xf32, #tpu.memory_space<vmem>>, vector<1x1x32xf32>
      %136 = vector.shape_cast %135 : vector<1x1x32xf32> to vector<1x32xf32>
      %137 = vector.shape_cast %133 : vector<1x32xf32> to vector<1x1x32xf32>
      %138 = vector.broadcast %137 : vector<1x1x32xf32> to vector<2x16x32xf32>
      %139 = arith.mulf %38, %138 : vector<2x16x32xf32>
      %140 = arith.truncf %139 : vector<2x16x32xf32> to vector<2x16x32xbf16>
      %cst_76 = arith.constant dense<0.000000e+00> : vector<2x16x16xf32>
      %141 = tpu.matmul %140, %41, %cst_76 {dimension_numbers = #tpu.dot_dimension_numbers<[2], [2], [1], [1], [0, 0, 0, 1, 1, 1], [0], [0]>} : vector<2x16x32xbf16>, vector<2x16x32xbf16>, vector<2x16x16xf32> -> vector<2x16x16xf32>
      %cst_77 = arith.constant dense<0xFF800000> : vector<2x16xf32>
      %142 = vector.multi_reduction <maximumf>, %141, %cst_77 [2] : vector<2x16x16xf32> to vector<2x16xf32>
      %143 = vector.shape_cast %142 : vector<2x16xf32> to vector<2x16x1xf32>
      %144 = vector.broadcast %143 : vector<2x16x1xf32> to vector<2x16x16xf32>
      %145 = arith.subf %141, %144 : vector<2x16x16xf32>
      %146 = math.exp %145 : vector<2x16x16xf32>
      %cst_78 = arith.constant dense<0.000000e+00> : vector<2x16xf32>
      %147 = vector.multi_reduction <add>, %146, %cst_78 [2] : vector<2x16x16xf32> to vector<2x16xf32>
      %148 = vector.shape_cast %147 : vector<2x16xf32> to vector<2x16x1xf32>
      %149 = tpu.reciprocal %148 {approx = true} : vector<2x16x1xf32> -> vector<2x16x1xf32>
      %150 = vector.broadcast %149 : vector<2x16x1xf32> to vector<2x16x16xf32>
      %151 = arith.mulf %146, %150 : vector<2x16x16xf32>
      %152 = arith.truncf %151 : vector<2x16x16xf32> to vector<2x16x16xbf16>
      %cst_79 = arith.constant dense<0.000000e+00> : vector<2x16x32xf32>
      %153 = tpu.matmul %152, %44, %cst_79 {dimension_numbers = #tpu.dot_dimension_numbers<[2], [1], [1], [2], [0, 0, 0, 1, 1, 2], [0], [0]>} : vector<2x16x16xbf16>, vector<2x16x32xbf16>, vector<2x16x32xf32> -> vector<2x16x32xf32>
      %154 = vector.shape_cast %136 : vector<1x32xf32> to vector<1x1x32xf32>
      %155 = vector.broadcast %154 : vector<1x1x32xf32> to vector<2x16x32xf32>
      %156 = arith.mulf %155, %153 : vector<2x16x32xf32>
      %157 = arith.addf %arg23, %156 : vector<2x16x32xf32>
      scf.yield %157 : vector<2x16x32xf32>
    }
    %c4_i32_22 = arith.constant 4 : i32
    %c0_23 = arith.constant 0 : index
    %c0_24 = arith.constant 0 : index
    %c0_25 = arith.constant 0 : index
    %48 = vector.load %arg10[%c0_23, %c0_24, %c0_25] : memref<1x1x32xf32, #tpu.memory_space<vmem>>, vector<1x1x32xf32>
    %49 = vector.shape_cast %48 : vector<1x1x32xf32> to vector<1x32xf32>
    %cst_26 = arith.constant dense<0.000000e+00> : vector<2x32xf32>
    %50 = vector.multi_reduction <add>, %43, %cst_26 [1] : vector<2x16x32xf32> to vector<2x32xf32>
    %51 = vector.shape_cast %50 : vector<2x32xf32> to vector<2x1x32xf32>
    %52 = vector.shape_cast %49 : vector<1x32xf32> to vector<1x1x32xf32>
    %53 = vector.broadcast %52 : vector<1x1x32xf32> to vector<2x1x32xf32>
    %54 = arith.mulf %53, %51 : vector<2x1x32xf32>
    %55 = vector.broadcast %54 : vector<2x1x32xf32> to vector<2x16x32xf32>
    %56 = arith.addf %47, %55 : vector<2x16x32xf32>
    %57 = vector.shape_cast %56 : vector<2x16x32xf32> to vector<32x32xf32>
    %58 = arith.truncf %57 : vector<32x32xf32> to vector<32x32xbf16>
    %c0_27 = arith.constant 0 : index
    %c0_28 = arith.constant 0 : index
    %c0_29 = arith.constant 0 : index
    %59 = vector.load %arg11[%c0_27, %c0_28, %c0_29] : memref<1x32x32xbf16, #tpu.memory_space<vmem>>, vector<1x32x32xbf16>
    %60 = vector.shape_cast %59 : vector<1x32x32xbf16> to vector<32x32xbf16>
    %cst_30 = arith.constant dense<0.000000e+00> : vector<32x32xf32>
    %61 = tpu.matmul %58, %60, %cst_30 {dimension_numbers = #tpu.dot_dimension_numbers<[1], [0], [0], [1], [0, 0, 1, 1], [], []>} : vector<32x32xbf16>, vector<32x32xbf16>, vector<32x32xf32> -> vector<32x32xf32>
    %c0_31 = arith.constant 0 : index
    %c0_32 = arith.constant 0 : index
    %c0_33 = arith.constant 0 : index
    %62 = vector.load %arg12[%c0_31, %c0_32, %c0_33] : memref<1x1x32xf32, #tpu.memory_space<vmem>>, vector<1x1x32xf32>
    %63 = vector.shape_cast %62 : vector<1x1x32xf32> to vector<1x32xf32>
    %64 = vector.broadcast %63 : vector<1x32xf32> to vector<32x32xf32>
    %65 = arith.addf %61, %64 : vector<32x32xf32>
    %c0_34 = arith.constant 0 : index
    %c0_35 = arith.constant 0 : index
    %c0_36 = arith.constant 0 : index
    %66 = vector.load %arg13[%c0_34, %c0_35, %c0_36] : memref<1x1x32xf32, #tpu.memory_space<vmem>>, vector<1x1x32xf32>
    %67 = vector.shape_cast %66 : vector<1x1x32xf32> to vector<1x32xf32>
    %68 = vector.broadcast %67 : vector<1x32xf32> to vector<32x32xf32>
    %69 = arith.mulf %68, %65 : vector<32x32xf32>
    %70 = arith.addf %4, %69 : vector<32x32xf32>
    %c0_37 = arith.constant 0 : index
    %c0_38 = arith.constant 0 : index
    %c0_39 = arith.constant 0 : index
    %71 = vector.load %arg14[%c0_37, %c0_38, %c0_39] : memref<1x1x32xf32, #tpu.memory_space<vmem>>, vector<1x1x32xf32>
    %72 = vector.shape_cast %71 : vector<1x1x32xf32> to vector<1x32xf32>
    %c0_40 = arith.constant 0 : index
    %c0_41 = arith.constant 0 : index
    %c0_42 = arith.constant 0 : index
    %73 = vector.load %arg15[%c0_40, %c0_41, %c0_42] : memref<1x1x32xf32, #tpu.memory_space<vmem>>, vector<1x1x32xf32>
    %74 = vector.shape_cast %73 : vector<1x1x32xf32> to vector<1x32xf32>
    %cst_43 = arith.constant dense<0.000000e+00> : vector<32xf32>
    %75 = vector.multi_reduction <add>, %70, %cst_43 [1] : vector<32x32xf32> to vector<32xf32>
    %76 = vector.shape_cast %75 : vector<32xf32> to vector<32x1xf32>
    %cst_44 = arith.constant 3.200000e+01 : f32
    %77 = vector.broadcast %cst_44 : f32 to vector<32x1xf32>
    %78 = arith.divf %76, %77 : vector<32x1xf32>
    %79 = vector.broadcast %78 : vector<32x1xf32> to vector<32x32xf32>
    %80 = arith.subf %70, %79 : vector<32x32xf32>
    %81 = arith.mulf %80, %80 : vector<32x32xf32>
    %cst_45 = arith.constant dense<0.000000e+00> : vector<32xf32>
    %82 = vector.multi_reduction <add>, %81, %cst_45 [1] : vector<32x32xf32> to vector<32xf32>
    %83 = vector.shape_cast %82 : vector<32xf32> to vector<32x1xf32>
    %cst_46 = arith.constant 3.200000e+01 : f32
    %84 = vector.broadcast %cst_46 : f32 to vector<32x1xf32>
    %85 = arith.divf %83, %84 : vector<32x1xf32>
    %cst_47 = arith.constant 9.99999997E-7 : f32
    %86 = vector.broadcast %cst_47 : f32 to vector<32x1xf32>
    %87 = arith.addf %85, %86 : vector<32x1xf32>
    %88 = math.rsqrt %87 : vector<32x1xf32>
    %89 = vector.broadcast %88 : vector<32x1xf32> to vector<32x32xf32>
    %90 = arith.mulf %80, %89 : vector<32x32xf32>
    %91 = vector.broadcast %72 : vector<1x32xf32> to vector<32x32xf32>
    %92 = arith.mulf %90, %91 : vector<32x32xf32>
    %93 = vector.broadcast %74 : vector<1x32xf32> to vector<32x32xf32>
    %94 = arith.addf %92, %93 : vector<32x32xf32>
    %95 = arith.truncf %94 : vector<32x32xf32> to vector<32x32xbf16>
    %c0_48 = arith.constant 0 : index
    %c0_49 = arith.constant 0 : index
    %c0_50 = arith.constant 0 : index
    %96 = vector.load %arg16[%c0_48, %c0_49, %c0_50] : memref<1x32x128xbf16, #tpu.memory_space<vmem>>, vector<1x32x128xbf16>
    %97 = vector.shape_cast %96 : vector<1x32x128xbf16> to vector<32x128xbf16>
    %cst_51 = arith.constant dense<0.000000e+00> : vector<32x128xf32>
    %98 = tpu.matmul %95, %97, %cst_51 {dimension_numbers = #tpu.dot_dimension_numbers<[1], [0], [0], [1], [0, 0, 1, 1], [], []>} : vector<32x32xbf16>, vector<32x128xbf16>, vector<32x128xf32> -> vector<32x128xf32>
    %c0_52 = arith.constant 0 : index
    %c0_53 = arith.constant 0 : index
    %c0_54 = arith.constant 0 : index
    %99 = vector.load %arg17[%c0_52, %c0_53, %c0_54] : memref<1x1x128xf32, #tpu.memory_space<vmem>>, vector<1x1x128xf32>
    %100 = vector.shape_cast %99 : vector<1x1x128xf32> to vector<1x128xf32>
    %101 = vector.broadcast %100 : vector<1x128xf32> to vector<32x128xf32>
    %102 = arith.addf %98, %101 : vector<32x128xf32>
    %cst_55 = arith.constant 5.000000e-01 : f32
    %103 = vector.broadcast %cst_55 : f32 to vector<32x128xf32>
    %104 = arith.mulf %103, %102 : vector<32x128xf32>
    %cst_56 = arith.constant 4.471500e-02 : f32
    %105 = vector.broadcast %cst_56 : f32 to vector<32x128xf32>
    %106 = arith.mulf %105, %102 : vector<32x128xf32>
    %107 = arith.mulf %106, %102 : vector<32x128xf32>
    %108 = arith.mulf %107, %102 : vector<32x128xf32>
    %109 = arith.addf %102, %108 : vector<32x128xf32>
    %cst_57 = arith.constant 0.797884583 : f32
    %110 = vector.broadcast %cst_57 : f32 to vector<32x128xf32>
    %111 = arith.mulf %110, %109 : vector<32x128xf32>
    %112 = math.tanh %111 : vector<32x128xf32>
    %cst_58 = arith.constant 1.000000e+00 : f32
    %113 = vector.broadcast %cst_58 : f32 to vector<32x128xf32>
    %114 = arith.addf %113, %112 : vector<32x128xf32>
    %115 = arith.mulf %104, %114 : vector<32x128xf32>
    %116 = arith.truncf %115 : vector<32x128xf32> to vector<32x128xbf16>
    %c0_59 = arith.constant 0 : index
    %c0_60 = arith.constant 0 : index
    %c0_61 = arith.constant 0 : index
    %117 = vector.load %arg18[%c0_59, %c0_60, %c0_61] : memref<1x128x32xbf16, #tpu.memory_space<vmem>>, vector<1x128x32xbf16>
    %118 = vector.shape_cast %117 : vector<1x128x32xbf16> to vector<128x32xbf16>
    %cst_62 = arith.constant dense<0.000000e+00> : vector<32x32xf32>
    %119 = tpu.matmul %116, %118, %cst_62 {dimension_numbers = #tpu.dot_dimension_numbers<[1], [0], [0], [1], [0, 0, 1, 1], [], []>} : vector<32x128xbf16>, vector<128x32xbf16>, vector<32x32xf32> -> vector<32x32xf32>
    %c0_63 = arith.constant 0 : index
    %c0_64 = arith.constant 0 : index
    %c0_65 = arith.constant 0 : index
    %120 = vector.load %arg19[%c0_63, %c0_64, %c0_65] : memref<1x1x32xf32, #tpu.memory_space<vmem>>, vector<1x1x32xf32>
    %121 = vector.shape_cast %120 : vector<1x1x32xf32> to vector<1x32xf32>
    %122 = vector.broadcast %121 : vector<1x32xf32> to vector<32x32xf32>
    %123 = arith.addf %119, %122 : vector<32x32xf32>
    %c0_66 = arith.constant 0 : index
    %c0_67 = arith.constant 0 : index
    %c0_68 = arith.constant 0 : index
    %124 = vector.load %arg20[%c0_66, %c0_67, %c0_68] : memref<1x1x32xf32, #tpu.memory_space<vmem>>, vector<1x1x32xf32>
    %125 = vector.shape_cast %124 : vector<1x1x32xf32> to vector<1x32xf32>
    %126 = vector.broadcast %125 : vector<1x32xf32> to vector<32x32xf32>
    %127 = arith.mulf %126, %123 : vector<32x32xf32>
    %128 = arith.addf %70, %127 : vector<32x32xf32>
    %129 = vector.shape_cast %128 : vector<32x32xf32> to vector<2x16x32xf32>
    %c0_69 = arith.constant 0 : index
    %c0_70 = arith.constant 0 : index
    %c0_71 = arith.constant 0 : index
    %130 = vector.load %arg21[%c0_69, %c0_70, %c0_71] : memref<2x16x32xf32, #tpu.memory_space<vmem>>, vector<2x16x32xf32>
    tpu.vector_store %arg21[%c0_69, %c0_70, %c0_71], %129 {strides = array<i32>} : memref<2x16x32xf32, #tpu.memory_space<vmem>>, vector<2x16x32xf32>,
    return
  }
  func.func @transform_0(%arg0: i32, %arg1: i32) -> (i32, i32, i32) {
    %c0_i32 = arith.constant 0 : i32
    %c0_i32_0 = arith.constant 0 : i32
    %c0_i32_1 = arith.constant 0 : i32
    return %arg0, %c0_i32, %c0_i32_0 : i32, i32, i32
  }
  func.func @transform_1(%arg0: i32, %arg1: i32) -> (i32, i32, i32) {
    %c0_i32 = arith.constant 0 : i32
    %c0_i32_0 = arith.constant 0 : i32
    %c0_i32_1 = arith.constant 0 : i32
    %c0_i32_2 = arith.constant 0 : i32
    return %c0_i32, %c0_i32_0, %c0_i32_1 : i32, i32, i32
  }
  func.func @transform_2(%arg0: i32, %arg1: i32) -> (i32, i32, i32) {
    %c0_i32 = arith.constant 0 : i32
    %c0_i32_0 = arith.constant 0 : i32
    %c0_i32_1 = arith.constant 0 : i32
    return %arg1, %c0_i32, %c0_i32_0 : i32, i32, i32
  }
  func.func @transform_3(%arg0: i32, %arg1: i32) -> (i32, i32, i32) {
    %c0_i32 = arith.constant 0 : i32
    %c0_i32_0 = arith.constant 0 : i32
    %c0_i32_1 = arith.constant 0 : i32
    return %arg1, %c0_i32, %c0_i32_0 : i32, i32, i32
  }
  func.func @transform_4(%arg0: i32, %arg1: i32) -> (i32, i32, i32) {
    %c0_i32 = arith.constant 0 : i32
    %c0_i32_0 = arith.constant 0 : i32
    %c0_i32_1 = arith.constant 0 : i32
    return %arg1, %c0_i32, %c0_i32_0 : i32, i32, i32
  }
  func.func @transform_5(%arg0: i32, %arg1: i32) -> (i32, i32, i32) {
    %c0_i32 = arith.constant 0 : i32
    %c0_i32_0 = arith.constant 0 : i32
    %c0_i32_1 = arith.constant 0 : i32
    return %arg1, %c0_i32, %c0_i32_0 : i32, i32, i32
  }
  func.func @transform_6(%arg0: i32, %arg1: i32) -> (i32, i32, i32) {
    %c0_i32 = arith.constant 0 : i32
    %c0_i32_0 = arith.constant 0 : i32
    %c0_i32_1 = arith.constant 0 : i32
    return %arg1, %c0_i32, %c0_i32_0 : i32, i32, i32
  }
  func.func @transform_7(%arg0: i32, %arg1: i32) -> (i32, i32, i32) {
    %c0_i32 = arith.constant 0 : i32
    %c0_i32_0 = arith.constant 0 : i32
    %c0_i32_1 = arith.constant 0 : i32
    return %arg1, %c0_i32, %c0_i32_0 : i32, i32, i32
  }
  func.func @transform_8(%arg0: i32, %arg1: i32) -> (i32, i32, i32) {
    %c0_i32 = arith.constant 0 : i32
    %c0_i32_0 = arith.constant 0 : i32
    %c0_i32_1 = arith.constant 0 : i32
    return %arg1, %c0_i32, %c0_i32_0 : i32, i32, i32
  }
  func.func @transform_9(%arg0: i32, %arg1: i32) -> (i32, i32, i32) {
    %c0_i32 = arith.constant 0 : i32
    %c0_i32_0 = arith.constant 0 : i32
    %c0_i32_1 = arith.constant 0 : i32
    return %arg1, %c0_i32, %c0_i32_0 : i32, i32, i32
  }
  func.func @transform_10(%arg0: i32, %arg1: i32) -> (i32, i32, i32) {
    %c0_i32 = arith.constant 0 : i32
    %c0_i32_0 = arith.constant 0 : i32
    %c0_i32_1 = arith.constant 0 : i32
    return %arg1, %c0_i32, %c0_i32_0 : i32, i32, i32
  }
  func.func @transform_11(%arg0: i32, %arg1: i32) -> (i32, i32, i32) {
    %c0_i32 = arith.constant 0 : i32
    %c0_i32_0 = arith.constant 0 : i32
    %c0_i32_1 = arith.constant 0 : i32
    return %arg1, %c0_i32, %c0_i32_0 : i32, i32, i32
  }
  func.func @transform_12(%arg0: i32, %arg1: i32) -> (i32, i32, i32) {
    %c0_i32 = arith.constant 0 : i32
    %c0_i32_0 = arith.constant 0 : i32
    %c0_i32_1 = arith.constant 0 : i32
    return %arg1, %c0_i32, %c0_i32_0 : i32, i32, i32
  }
  func.func @transform_13(%arg0: i32, %arg1: i32) -> (i32, i32, i32) {
    %c0_i32 = arith.constant 0 : i32
    %c0_i32_0 = arith.constant 0 : i32
    %c0_i32_1 = arith.constant 0 : i32
    return %arg1, %c0_i32, %c0_i32_0 : i32, i32, i32
  }
  func.func @transform_14(%arg0: i32, %arg1: i32) -> (i32, i32, i32) {
    %c0_i32 = arith.constant 0 : i32
    %c0_i32_0 = arith.constant 0 : i32
    %c0_i32_1 = arith.constant 0 : i32
    return %arg1, %c0_i32, %c0_i32_0 : i32, i32, i32
  }
  func.func @transform_15(%arg0: i32, %arg1: i32) -> (i32, i32, i32) {
    %c0_i32 = arith.constant 0 : i32
    %c0_i32_0 = arith.constant 0 : i32
    %c0_i32_1 = arith.constant 0 : i32
    return %arg1, %c0_i32, %c0_i32_0 : i32, i32, i32
  }
  func.func @transform_16(%arg0: i32, %arg1: i32) -> (i32, i32, i32) {
    %c0_i32 = arith.constant 0 : i32
    %c0_i32_0 = arith.constant 0 : i32
    %c0_i32_1 = arith.constant 0 : i32
    return %arg1, %c0_i32, %c0_i32_0 : i32, i32, i32
  }
  func.func @transform_17(%arg0: i32, %arg1: i32) -> (i32, i32, i32) {
    %c0_i32 = arith.constant 0 : i32
    %c0_i32_0 = arith.constant 0 : i32
    %c0_i32_1 = arith.constant 0 : i32
    return %arg1, %c0_i32, %c0_i32_0 : i32, i32, i32
  }
  func.func @transform_18(%arg0: i32, %arg1: i32) -> (i32, i32, i32) {
    %c0_i32 = arith.constant 0 : i32
    %c0_i32_0 = arith.constant 0 : i32
    %c0_i32_1 = arith.constant 0 : i32
    return %arg1, %c0_i32, %c0_i32_0 : i32, i32, i32
  }
  func.func @transform_19(%arg0: i32, %arg1: i32) -> (i32, i32, i32) {
    %c0_i32 = arith.constant 0 : i32
    %c0_i32_0 = arith.constant 0 : i32
    %c0_i32_1 = arith.constant 0 : i32
    return %arg0, %c0_i32, %c0_i32_0 : i32, i32, i32
  }
}

</mosaic_0001>

<bundles_post_ra>
// kernel: tpu_custom_call.1
= control target key start
LH: loop header
LB: loop body
LE: loop exit
PB: predicated region body
PF: predicated region fallthrough
CT: control target
= control target key end

     0   :  { %s3096_s0 = inlined_call_operand.vmem [shape: f32[2,16,32], index: 0, kind: input, shape index: {}]   ;;  %s3097_s1 = inlined_call_operand.vmem [shape: f32[1,16,32], index: 1, kind: input, shape index: {}]   ;;  %s3098_s2 = inlined_call_operand.hbm [shape: f32[2,1,32], index: 2, kind: input, shape index: {}]   ;;  %s3099_s3 = inlined_call_operand.hbm [shape: f32[2,1,32], index: 3, kind: input, shape index: {}]   ;;  %s3100_s4 = inlined_call_operand.vmem [shape: bf16[2,32,96], index: 4, kind: input, shape index: {}]   ;;  %s3101_s5 = inlined_call_operand.vmem [shape: f32[2,1,96], index: 5, kind: input, shape index: {}]   ;;  %s3102_s6 = inlined_call_operand.vmem [shape: f32[2,4,32], index: 6, kind: input, shape index: {}]   ;;  %s3103_s7 = inlined_call_operand.vmem [shape: f32[2,4,32], index: 7, kind: input, shape index: {}]   ;;  %s3104_s8 = inlined_call_operand.vmem [shape: f32[2,1,32], index: 8, kind: input, shape index: {}]   ;;  %s3105_s9 = inlined_call_operand.vmem [shape: bf16[2,32,32], index: 9, kind: input, shape index: {}]   ;;  %s3106_s10 = inlined_call_operand.vmem [shape: f32[2,1,32], index: 10, kind: input, shape index: {}]   ;;  %s3107_s11 = inlined_call_operand.vmem [shape: f32[2,1,32], index: 11, kind: input, shape index: {}]   ;;  %s3108_s12 = inlined_call_operand.vmem [shape: f32[2,1,32], index: 12, kind: input, shape index: {}]   ;;  %s3109_s13 = inlined_call_operand.hbm [shape: f32[2,1,32], index: 13, kind: input, shape index: {}]   ;;  %s3110_s14 = inlined_call_operand.vmem [shape: bf16[2,32,128], index: 14, kind: input, shape index: {}]   ;;  %s3111_s15 = inlined_call_operand.vmem [shape: f32[2,1,128], index: 15, kind: input, shape index: {}]   ;;  %s3112_s16 = inlined_call_operand.vmem [shape: bf16[2,128,32], index: 16, kind: input, shape index: {}]   ;;  %s3113_s17 = inlined_call_operand.vmem [shape: f32[2,1,32], index: 17, kind: input, shape index: {}]   ;;  %s3114_s18 = inlined_call_operand.vmem [shape: f32[2,1,32], index: 18, kind: input, shape index: {}]   ;;  %s3115_s19 = inlined_call_operand.hbm [shape: f32[2,16,32], index: 19, kind: output, shape index: {}]  }
   0x1   :  { %3124 = sst [smem:[#allocation19_spill]] %s3096_s0 }
   0x2   :  { %3125 = sst [smem:[#allocation20_spill]] %s3097_s1 }
   0x3   :  { %3126 = sst [smem:[#allocation21_spill]] %s3098_s2 }
   0x4   :  { %3127 = sst [smem:[#allocation22_spill]] %s3099_s3 }
   0x5   :  { %3128 = sst [smem:[#allocation23_spill]] %s3100_s4 }
   0x6   :  { %3129 = sst [smem:[#allocation24_spill]] %s3102_s6 }
   0x7   :  { %3130 = sst [smem:[#allocation25_spill]] %s3103_s7 }
   0x8   :  { %3131 = sst [smem:[#allocation26_spill]] %s3105_s9 }
   0x9   :  { %3132 = sst [smem:[#allocation27_spill]] %s3106_s10 }
   0xa   :  { %3133 = sst [smem:[#allocation28_spill]] %s3107_s11 }
   0xb   :  { %3134 = sst [smem:[#allocation29_spill]] %s3108_s12 }
   0xc   :  { %3135 = sst [smem:[#allocation30_spill]] %s3109_s13 }
   0xd   :  { %3136 = sst [smem:[#allocation31_spill]] %s3110_s14 }
   0xe   :  { %3137 = sst [smem:[#allocation32_spill]] %s3111_s15 }
   0xf   :  { %3138 = sst [smem:[#allocation33_spill]] %s3112_s16 }
  0x10   :  { %3139 = sst [smem:[#allocation34_spill]] %s3113_s17 }
  0x11   :  { %3140 = sst [smem:[#allocation35_spill]] %s3114_s18 }
  0x12   :  { %3141 = sst [smem:[#allocation36_spill]] %s3115_s19 }
  0x13   :  { %24 = vsyncpa [#allocation3], 0 }
  0x14   :  { %26 = vsyncpa [#allocation3 + $0x1], 0 }
  0x15   :  { %27 = vsyncpa [#allocation6], 0 }
  0x16   :  { %29 = vsyncpa [#allocation6 + $0x1], 0 }
  0x17   :  { %30 = vsyncpa [#allocation4], 0  ;;  %s2609_s0 = smov 0   ;;  %s2611_s30 = smov 0  }
  0x18   :  { %s2613_s20 = smov 0   ;;  %s2615_s21 = smov 0  }
  0x19   :  { %s2617_s1 = smov 0   ;;  %s2619_s22 = smov 0  }
  0x1a LB: > { %3142 = sst [smem:[#allocation12_spill]] %s2464_s30  ;;  %s2638_s2 = sadd.s32 4294967295, %s2480_s22   ;;  %s2480_s22 = sphi %s2619_s22, %s36_s22   ;;  %s2476_s1 = sphi %s2617_s1, %s3192_s1   ;;  %s2472_s21 = sphi %s2615_s21, %s3191_s21   ;;  %s2468_s20 = sphi %s2613_s20, %s3190_s20   ;;  %s2464_s30 = sphi %s2611_s30, %s3189_s30   ;;  %s2460_s0 = sphi %s2609_s0, %s3188_s0  }
  0x1b   : > { %3143 = sst [smem:[#allocation13_spill]] %s2468_s20  ;;  %s45_s23 = sadd.s32 1, %s2476_s1 }
  0x1c   : > { %3144 = sst [smem:[#allocation14_spill]] %s2476_s1  ;;  %p46_p0 = scmp.ge.s32.totalorder %s45_s23, 2 }
  0x1d   : > { %3145 = sst [smem:[#allocation15_spill]] %s2480_s22  ;;  %s102_s24 = sadd.s32 1, %s2468_s20 }
  0x1e   : > { %3146 = sst [smem:[#allocation16_spill]] %s2638_s2  ;;  %p109_p1 = scmp.ne.s32.totalorder %s2468_s20, %s2464_s30 }
  0x1f   : > { %p110_p2 = scmp.eq.s32.totalorder %s2480_s22, 0  ;;  %s3194_s23 = smov (%p46_p0, %s45_s23), 0 }
  0x20   : > { %3147 = sst [smem:[#allocation17_spill]] %s3194_s23  ;;  %p115_p4 = scmp.ne.s32.totalorder %s2464_s30, %s2460_s0 }
  0x21   : > { %p111_p3 = por %p110_p2, %p109_p1  ;;  %s99_s25 = ssub.s32 %s2476_s1, %s3194_s23 }
  0x22   : > { %p116_p5 = scmp.eq.s32.totalorder %s2638_s2, 0  ;;  %p100_p6 = scmp.eq.s32.totalorder %s99_s25, 0 }
  0x23   : > { %p2132_p8 = scmp.lt.s32.totalorder %s2480_s22, 2  ;;  %s594_s27 = sand.u32 1, %s2468_s20  }
  0x24   : > { %p2651_p7 = por %p116_p5, %p115_p4  ;;  %s611_s29 = sand.u32 1, %s2480_s22  }
  0x25   : > { %s2657_s26 = scalar_select %p100_p6, %s2468_s20, %s102_s24  }
  0x26   : > { %p2660_p9 = pnand %p2132_p8, %p111_p3  ;;  %s3151_s19 = sld [smem:[#allocation22_spill]] }
  0x27   : > { %3149 = sst [smem:[#allocation18_spill]] %s2657_s26  ;;  %s614_s18 = scalar_lea.vmem [#allocation5], %s594_s27 }
  0x28   : > { %s621_s17 = sshll.u32 %s614_s18, 4  ;;  %p2002_p10 = scmp.ge.s32.totalorder %s2480_s22, 1  ;;  %s622_s17 = int_to_ptr.vmem [resolvable:$true] %s621_s17 }
  0x29   : > { %s612_s24 = scalar_lea.sflag [#allocation6], %s611_s29  ;;  %p737_p11 = scmp.lt.s32.totalorder %s2480_s22, 3 }
  0x2a   : > { %s597_s18 = scalar_lea.vmem [#allocation2], %s594_s27  ;;  %s595_s14 = scalar_lea.sflag [#allocation3], %s594_s27 }
  0x2b   : > { %p2673_p12 = pnand %p2002_p10, %p737_p11  ;;  %s604_s15 = sshll.u32 %s597_s18, 4  ;;  %s605_s15 = int_to_ptr.vmem [resolvable:$true] %s604_s15 }
  0x2c   : > { %s617_s25 = scalar_lea.hbm %s3151_s19, %s2476_s1  ;;  %s3153_s19 = sld [smem:[#allocation21_spill]] }
  0x2d   : > { %s619_s16 = sshll.u32 %s617_s25, 4  ;;  %s3154_s13 = sld [smem:[#allocation30_spill]]  ;;  %s620_s16 = int_to_ptr.hbm [resolvable:$true] %s619_s16 }
  0x2e   : > { %2128 = dma.hbm_to_vmem [thread:$0]  (!%p2660_p9), %s620_s16, 16, %s622_s17, %s612_s24  }
  0x2f   : > { %s691_s22 = scalar_lea.vmem [#allocation7], %s594_s27  ;;  %s2692_s20 = sand.u32 (!%p2673_p12), 1, %s2464_s30  }
  0x30   : > { %s698_s12 = sshll.u32 %s691_s22, 4  ;;  %s699_s12 = int_to_ptr.vmem [resolvable:$true] %s698_s12 }
  0x32   : > { %s600_s0 = scalar_lea.hbm %s3153_s19, %s2476_s1  ;;  %741 = sbr.rel (%p2673_p12) target bundleno = 2042 (0x7fa), region = 96 }
  0x33   : > { %s602_s25 = sshll.u32 %s600_s0, 4  ;;  %s694_s17 = scalar_lea.hbm %s3154_s13, %s2476_s1  ;;  %s603_s25 = int_to_ptr.hbm [resolvable:$true] %s602_s25 }
  0x34   : > { %2125 = dma.hbm_to_vmem [thread:$0]  (!%p2660_p9), %s603_s25, 16, %s605_s15, %s595_s14  }
  0x35   : > { %s696_s11 = sshll.u32 %s694_s17, 4  ;;  %s744_s14 = scalar_lea.sflag (!%p2673_p12), [#allocation3], %s2692_s20  ;;  %s697_s11 = int_to_ptr.hbm [resolvable:$true] %s696_s11 }
  0x36   : > { %2131 = dma.hbm_to_vmem [thread:$0]  (!%p2660_p9), %s697_s11, 16, %s699_s12, %s612_s24  }
  0x37   : > { %2447 = dma.done.wait (%p2651_p7), %s744_s14, 16  }
  0x38   : > { %2449 = vsyncadd (%p2651_p7), %s744_s14, 4294967280  ;;  %s752_s11 = sand.u32 1, %s2638_s2  }
  0x39   : > { %s753_s12 = scalar_lea.sflag [#allocation6], %s752_s11 }
  0x3a   : > { %2451 = dma.done.wait (%p2651_p7), %s753_s12, 32  }
  0x3b   : > { %2453 = vsyncadd (%p2651_p7), %s753_s12, 4294967264  ;;  %p887_p13 = scmp.lt.s32.totalorder %s2472_s21, 1  ;;  %s3155_s4 = sld [smem:[#allocation23_spill]] }
  0x3c   : > { %s3156_s6 = sld [smem:[#allocation24_spill]]  ;;  %p2013_p0 = scmp.ne.s32.totalorder %s2472_s21, 0 }
  0x3d   : > { %s2708_s26 = scalar_select %p887_p13, %s2472_s21, 1 }
  0x3e   : > { %s3157_s7 = sld [smem:[#allocation25_spill]] }
  0x3f   : > { %s2084_s27 = sshll.u32 %s2708_s26, 4  ;;  %s2005_s18 = sshll.u32 %s2708_s26, 2 }
  0x40   : > { %s3158_s9 = sld [smem:[#allocation26_spill]]  ;;  %s2087_s2 = sshll.u32 %s2708_s26, 6 }
  0x41   : > { %s2718_s0 = scalar_lea.vmem %s3155_s4, %s2084_s27  ;;  %s3162_s28 = sld [smem:[#allocation31_spill]] }
  0x42   : > { %s2724_s16 = scalar_lea.vmem %s3156_s6, %s2005_s18  ;;  %s3160_s6 = sld [smem:[#allocation28_spill]] }
  0x43   : > { %s3164_s25 = sld [smem:[#allocation33_spill]] }
  0x44   : > { %s2729_s11 = scalar_lea.vmem %s3157_s7, %s2005_s18  ;;  %s3165_s29 = sld [smem:[#allocation34_spill]] }
  0x45   : > { %s3166_s7 = sld [smem:[#allocation35_spill]] }
  0x46   : > { %s2738_s19 = scalar_lea.vmem %s3158_s9, %s2084_s27  ;;  %s3163_s9 = sld [smem:[#allocation32_spill]] }
  0x47   : > { %s2755_s24 = scalar_lea.vmem %s3162_s28, %s2084_s27  ;;  %s764_s27 = scalar_lea.vmem [#allocation7], %s2692_s20 }
  0x48   : > { %s916_s13 = scalar_lea.vmem %s3160_s6, %s2708_s26  ;;  %944 = sbr.rel (%p2013_p0) target bundleno = 87 (0x57), region = 112 }
  0x49   : > { %s2765_s10 = scalar_lea.vmem %s3164_s25, %s2087_s2  ;;  %s3167_s28 = sld [smem:[#allocation19_spill]] (!%p2013_p0) }
  0x4a   : > { %s935_s17 = scalar_lea.vmem %s3165_s29, %s2708_s26  ;;  %s3168_s2 = sld [smem:[#allocation20_spill]] (!%p2013_p0) }
  0x4b   : > { %s938_s1 = scalar_lea.vmem %s3166_s7, %s2708_s26 }
  0x4c   : > { %s927_s30 = scalar_lea.vmem %s3163_s9, %s2708_s26 }
  0x4d   : > { %vm955_vm0 = vcmask 261120  }
  0x4f   : > { %v945_v0 = vld [vmem:[%s3167_s28] sm:$0xff]  ;;  %v946_v2 = vld [vmem:[%s3167_s28 + $0x8] sm:$0xff]  ;;  %v947_v5 = vld [vmem:[%s3167_s28 + $0x10] sm:$0xff] }
  0x50   : > { %v949_v1 = vld [vmem:[%s3168_s2] sm:$0xff]  ;;  %v950_v4 = vld [vmem:[%s3168_s2 + $0x8] sm:$0xff]  ;;  %v948_v6 = vld [vmem:[%s3167_s28 + $0x18] sm:$0xff] }
  0x51   : > { %v951_v3 = vadd.f32 %v949_v1, %v945_v0  ;;  %v952_v7 = vadd.f32 %v950_v4, %v946_v2  ;;  %v953_v8 = vadd.f32 %v949_v1, %v947_v5  ;;  %v954_v9 = vadd.f32 %v950_v4, %v948_v6 }
  0x53   : > { %956 = vst.msk [vmem:[#allocation8] sm:$0xff] %vm955_vm0, %v951_v3 }
  0x54   : > { %957 = vst.msk [vmem:[#allocation8 + $0x8] sm:$0xff] %vm955_vm0, %v952_v7 }
  0x55   : > { %958 = vst.msk [vmem:[#allocation8 + $0x10] sm:$0xff] %vm955_vm0, %v953_v8 }
  0x56   : > { %959 = vst.msk [vmem:[#allocation8 + $0x18] sm:$0xff] %vm955_vm0, %v954_v9 }
  0x57 PF: > { %vm966_vm1 = vcmask 261120   ;;  %v2502_v18 = vmov 32.0   ;;  %v2089_v45 = vld [vmem:[%s2718_s0 + $0x8] sm:$0xff]  ;;  %v2088_v50 = vld [vmem:[%s2718_s0] sm:$0xff]  ;;  %s3169_s0 = scalar_lea.vmem [#allocation2], %s2692_s20  ;;  %s3170_s18 = scalar_lea.vmem [#allocation5], %s2692_s20 }
  0x58   : > { %2233 = vrcp.f32 %v2502_v18  ;;  %1110 = vmatpush.bf16.msra.mxu0 %v2089_v45  ;;  %2102 = vmatpush.bf16.msra.mxu1 %v2089_v45  ;;  %s3171_s9 = scalar_lea.vmem %s3101_s5, %s2708_s26  ;;  %s2886_s3 = smov 0  }
  0x5a   : > { %v2797_v11 = vld [vmem:[#allocation8] sm:$0xff] }
  0x5b   : > { %v967_v13 = vsel %vm966_vm1, %v2797_v11, 0.0  ;;  %v2805_v15 = vld [vmem:[#allocation8 + $0x8] sm:$0xff] }
  0x5c   : > { %v2795_v10 = vld [vmem:[#allocation8 + $0x10] sm:$0xff]  ;;  %968 = vadd.xlane.f32.xlu0 %v967_v13  ;;  %v970_v17 = vsel %vm966_vm1, %v2805_v15, 0.0  ;;  %1111 = vmatpush.bf16.msra.mxu0 %v2088_v50 }
  0x5d   : > { %v973_v12 = vsel %vm966_vm1, %v2795_v10, 0.0  ;;  %v2803_v14 = vld [vmem:[#allocation8 + $0x18] sm:$0xff]  ;;  %2103 = vmatpush.bf16.msra.mxu1 %v2088_v50 }
  0x5e   : > { %974 = vadd.xlane.f32.xlu1 %v973_v12  ;;  %v976_v16 = vsel %vm966_vm1, %v2803_v14, 0.0  ;;  %v2234_v19 = vpop.eup %2233 }
  0x5f   : > { %v980_v20 = vmul.f32 32.0, %v2234_v19  ;;  %vm984_vm2 = vweird.f32 %v2234_v19 }
  0x61   : > { %v981_v21 = vsub.f32 1.0, %v980_v20 }
  0x63   : > { %v982_v22 = vmul.f32 %v2234_v19, %v981_v21 }
  0x64   : > { %971 = vadd.xlane.f32.xlu0 %v970_v17 }
  0x65   : > { %v983_v23 = vadd.f32 %v2234_v19, %v982_v22 }
  0x66   : > { %977 = vadd.xlane.f32.xlu1 %v976_v16 }
  0x67   : > { %v2811_v24 = vsel %vm984_vm2, %v2234_v19, %v983_v23 }
  0xcf   : > { %v969_v26 = vpop.xlane.xlu0 %968 }
  0xd0   : > { %v986_v28 = vmul.f32 %v2811_v24, %v969_v26 }
  0xd1   : > { %v975_v25 = vpop.xlane.xlu1 %974 }
  0xd2   : > { %v988_v27 = vmul.f32 %v2811_v24, %v975_v25  ;;  %v2819_v30 = vsub.f32 %v2797_v11, %v986_v28  ;;  %v2230_v25 = vld [vmem:[%s3169_s0] ss:$0 sm:$0xff] }
  0xd4   : > { %v2816_v29 = vsub.f32 %v2795_v10, %v988_v27  ;;  %v994_v32 = vmul.f32 %v2819_v30, %v2819_v30 }
  0xd6   : > { %v996_v31 = vmul.f32 %v2816_v29, %v2816_v29  ;;  %v998_v34 = vsel %vm966_vm1, %v994_v32, 0.0 }
  0xd7   : > { %999 = vadd.xlane.f32.xlu2 %v998_v34  ;;  %v972_v36 = vpop.xlane.xlu0 %971  ;;  %v2231_v34 = vld [vmem:[%s3170_s18] ss:$0 sm:$0xff] }
  0xd8   : > { %v1004_v33 = vsel %vm966_vm1, %v996_v31, 0.0  ;;  %v987_v38 = vmul.f32 %v2811_v24, %v972_v36 }
  0xd9   : > { %v978_v35 = vpop.xlane.xlu1 %977  ;;  %1005 = vadd.xlane.f32.xlu0 %v1004_v33 }
  0xda   : > { %v989_v37 = vmul.f32 %v2811_v24, %v978_v35  ;;  %v2833_v40 = vsub.f32 %v2805_v15, %v987_v38 }
  0xdc   : > { %v2830_v39 = vsub.f32 %v2803_v14, %v989_v37  ;;  %v995_v42 = vmul.f32 %v2833_v40, %v2833_v40 }
  0xde   : > { %v997_v41 = vmul.f32 %v2830_v39, %v2830_v39  ;;  %v1001_v44 = vsel %vm966_vm1, %v995_v42, 0.0 }
  0xdf   : > { %1002 = vadd.xlane.f32.xlu2 %v1001_v44 }
  0xe0   : > { %v1007_v43 = vsel %vm966_vm1, %v997_v41, 0.0 }
  0xe1   : > { %1008 = vadd.xlane.f32.xlu1 %v1007_v43 }
 0x14a   : > { %v1000_v46 = vpop.xlane.xlu2 %999 }
 0x14b   : > { %v1010_v48 = vmul.f32 %v1000_v46, %v2811_v24 }
 0x14c   : > { %v1006_v47 = vpop.xlane.xlu0 %1005 }
 0x14d   : > { %v1012_v49 = vmul.f32 %v1006_v47, %v2811_v24  ;;  %v1014_v51 = vadd.f32 1e-06, %v1010_v48 }
 0x14f   : > { %v1016_v52 = vadd.f32 1e-06, %v1012_v49  ;;  %2235 = vrsqrt.f32 %v1014_v51  ;;  %vm1024_vm6 = vweird.f32 %v1014_v51 }
 0x151   : > { %2237 = vrsqrt.f32 %v1016_v52  ;;  %vm1044_vm5 = vweird.f32 %v1016_v52 }
 0x152   : > { %v1003_v54 = vpop.xlane.xlu2 %1002 }
 0x153   : > { %v1011_v56 = vmul.f32 %v1003_v54, %v2811_v24 }
 0x154   : > { %v1009_v53 = vpop.xlane.xlu1 %1008 }
 0x155   : > { %v1013_v55 = vmul.f32 %v1009_v53, %v2811_v24  ;;  %v2236_v57 = vpop.eup %2235  ;;  %v1015_v59 = vadd.f32 1e-06, %v1011_v56 }
 0x156   : > { %v1019_v61 = vmul.f32 %v2236_v57, %v1014_v51  ;;  %vm1025_vm4 = vweird.f32 %v2236_v57 }
 0x157   : > { %v1017_v58 = vadd.f32 1e-06, %v1013_v55  ;;  %v2238_v60 = vpop.eup %2237  ;;  %vm1026_vm8 = vmor %vm1024_vm6, %vm1025_vm4  ;;  %vm1034_vm13 = vweird.f32 %v1015_v59 }
 0x158   : > { %v1039_v62 = vmul.f32 %v2238_v60, %v1016_v52  ;;  %v1020_v63 = vmul.f32 %v2236_v57, %v1019_v61  ;;  %vm1045_vm3 = vweird.f32 %v2238_v60 }
 0x159   : > { %2239 = vrsqrt.f32 %v1017_v58  ;;  %vm1046_vm7 = vmor %vm1044_vm5, %vm1045_vm3  ;;  %vm1054_vm11 = vweird.f32 %v1017_v58 }
 0x15a   : > { %2241 = vrsqrt.f32 %v1015_v59  ;;  %v1040_v0 = vmul.f32 %v2238_v60, %v1039_v62  ;;  %v1021_v1 = vmul.f32 0.5, %v1020_v63 }
 0x15c   : > { %v1041_v2 = vmul.f32 0.5, %v1040_v0  ;;  %v1022_v3 = vsub.f32 1.5, %v1021_v1 }
 0x15e   : > { %v1042_v5 = vsub.f32 1.5, %v1041_v2  ;;  %v1023_v8 = vmul.f32 %v2236_v57, %v1022_v3 }
 0x15f   : > { %v2240_v4 = vpop.eup %2239 }
 0x160   : > { %v2242_v6 = vpop.eup %2241  ;;  %v1049_v7 = vmul.f32 %v2240_v4, %v1017_v58  ;;  %v1043_v9 = vmul.f32 %v2238_v60, %v1042_v5  ;;  %v1027_v19 = vsel %vm1026_vm8, %v2236_v57, %v1023_v8  ;;  %vm1055_vm9 = vweird.f32 %v2240_v4 }
 0x161   : > { %v1029_v12 = vmul.f32 %v2242_v6, %v1015_v59  ;;  %vm1035_vm10 = vweird.f32 %v2242_v6  ;;  %v1058_v26 = vmul.f32 %v1027_v19, %v2819_v30  ;;  %vm1056_vm12 = vmor %vm1054_vm11, %vm1055_vm9  ;;  %v2878_v57 = vmov 0.0  }
 0x162   : > { %v1050_v13 = vmul.f32 %v2240_v4, %v1049_v7  ;;  %v1047_v17 = vsel %vm1046_vm7, %v2238_v60, %v1043_v9  ;;  %vm1036_vm14 = vmor %vm1034_vm13, %vm1035_vm10  ;;  %v2880_v58 = vmov 0.0   ;;  %v2882_v59 = vmov 0.0  }
 0x163   : > { %v1030_v16 = vmul.f32 %v2242_v6, %v1029_v12  ;;  %v1060_v22 = vmul.f32 %v1047_v17, %v2816_v29  ;;  %v1065_v36 = vmul.f32 %v2230_v25, %v1058_v26  ;;  %v2884_v60 = vmov 0.0  }
 0x164   : > { %v1051_v18 = vmul.f32 0.5, %v1050_v13 }
 0x165   : > { %v1031_v20 = vmul.f32 0.5, %v1030_v16  ;;  %v1067_v29 = vmul.f32 %v2230_v25, %v1060_v22  ;;  %v1072_v42 = vadd.f32 %v2231_v34, %v1065_v36 }
 0x166   : > { %v1052_v21 = vsub.f32 1.5, %v1051_v18 }
 0x167   : > { %v1032_v23 = vsub.f32 1.5, %v1031_v20  ;;  %v1074_v30 = vadd.f32 %v2231_v34, %v1067_v29 }
 0x168   : > { %v1053_v27 = vmul.f32 %v2240_v4, %v1052_v21 }
 0x169   : > { %v1033_v28 = vmul.f32 %v2242_v6, %v1032_v23 }
 0x16a   : > { %v1057_v31 = vsel %vm1056_vm12, %v2240_v4, %v1053_v27 }
 0x16b   : > { %v1061_v32 = vmul.f32 %v1057_v31, %v2830_v39  ;;  %v1037_v33 = vsel %vm1036_vm14, %v2242_v6, %v1033_v28  ;;  %v2232_v39 = vld [vmem:[%s3171_s9] ss:$0 sm:$0xff] }
 0x16c   : > { %v1059_v35 = vmul.f32 %v1037_v33, %v2833_v40 }
 0x16d   : > { %v1068_v37 = vmul.f32 %v2230_v25, %v1061_v32 }
 0x16e   : > { %v1066_v38 = vmul.f32 %v2230_v25, %v1059_v35 }
 0x16f   : > { %v1075_v41 = vadd.f32 %v2231_v34, %v1068_v37 }
 0x170   : > { %v1073_v43 = vadd.f32 %v2231_v34, %v1066_v38 }
 0x171   : > { %v1077_v44 = vpack.c.bf16 %v1075_v41, %v1074_v30 }
 0x172   : > { %v1076_v45 = vpack.c.bf16 %v1073_v43, %v1072_v42 }
 0x173   : > { %2023 = vmatmul.msk.bf16.vlgmr.msra.gmra.mxu1 %vm966_vm1, %v1077_v44 }
 0x174   : > { %2022 = vmatmul.msk.bf16.vlgmr.msra.gmra.mxu0 %vm966_vm1, %v1076_v45 }
 0x1f0   : > { %v1118_v46 = vpop.f32.mrf.mxu1 }
 0x1f1   : > { %v1113_v40 = vpop.f32.mrf.mxu0  ;;  %v2862_v47 = vadd.f32 %v2232_v39, %v1118_v46 }
 0x1f2   : > { %v2864_v48 = vadd.f32 %v2232_v39, %v1113_v40 }
 0x1f3   : > { %v1125_v49 = vpack.c.bf16 %v2862_v47, %v2862_v47 }
 0x1f4   : > { %v1123_v50 = vpack.c.bf16 %v2864_v48, %v2864_v48 }
 0x1f8   : > { %v1120_v51 = vpop.f32.mrf.mxu1 }
 0x1f9   : > { %v1115_v52 = vpop.f32.mrf.mxu0  ;;  %v2870_v53 = vadd.f32 %v2232_v39, %v1120_v51 }
 0x1fa   : > { %v2872_v54 = vadd.f32 %v2232_v39, %v1115_v52 }
 0x1fb   : > { %v1126_v55 = vpack.c.bf16 %v2870_v53, %v2870_v53 }
 0x1fc   : > { %v1124_v56 = vpack.c.bf16 %v2872_v54, %v2872_v54 }
 0x1fd LB: >> { %v1157_v61 = vunpack.c.l.b16 %v1123_v50  ;;  %s1137_s23 = scalar_lea.vmem %s2724_s16, %s2500_s3  ;;  %s2503_s25 = smov 96   ;;  %v1189_v0 = vunpack.c.l.b16 %v1125_v49  ;;  %v1190_v1 = vunpack.c.l.b16 %v1126_v55  ;;  %vm1214_vm15 = vcmask 130048   ;;  %s2500_s3 = sphi %s2886_s3, %s1132_s3   ;;  %v2496_v60 = vphi %v2884_v60, %v3175_v60   ;;  %v2492_v59 = vphi %v2882_v59, %v3174_v59   ;;  %v2488_v58 = vphi %v2880_v58, %v3173_v58   ;;  %v2484_v57 = vphi %v2878_v57, %v3172_v57  }
 0x1fe   : >> { %v1158_v62 = vunpack.c.l.b16 %v1124_v56  ;;  %v2243_v3 = vld [vmem:[%s1137_s23] ss:$0 sm:$0xff]  ;;  %s2504_s15 = smov 64   ;;  %s1139_s22 = scalar_lea.vmem %s2729_s11, %s2500_s3 }
 0x1ff   : >> { %v2920_v2 = vpack.c.b16 %v1190_v1, %v1189_v0  ;;  %v1142_v4 = vmul.f32 %v2243_v3, %v2864_v48  ;;  %v1143_v5 = vmul.f32 %v2243_v3, %v2872_v54  ;;  %v1144_v16 = vmul.f32 %v2243_v3, %v2862_v47  ;;  %s1132_s3 = sadd.s32 1, %s2500_s3  }
 0x200   : >> { %v2909_v63 = vpack.c.b16 %v1158_v62, %v1157_v61  ;;  %v1145_v17 = vmul.f32 %v2243_v3, %v2870_v53  ;;  %p1129_p1 = scmp.ge.s32.totalorder %s1132_s3, 4  }
 0x201   : >> { %v1146_v6 = vpack.c.bf16 %v1142_v4, %v1142_v4  ;;  %v1147_v7 = vpack.c.bf16 %v1143_v5, %v1143_v5  ;;  %v1148_v19 = vpack.c.bf16 %v1144_v16, %v1144_v16  ;;  %vm1323_vm0 = vcmask (%p1129_p1), 785920   ;;  %s2505_s16 = smov (%p1129_p1), 64   ;;  %v2090_v56 = vld [vmem:[%s2738_s19] sm:$0xff] (%p1129_p1)  ;;  %s3176_s21 = scalar_lea.vmem (%p1129_p1), %s3104_s8, %s2708_s26 }
 0x202   : >> { %1160 = vrot.lane.b32.xlu0 %v2909_v63, %s2503_s25  ;;  %v1149_v20 = vpack.c.bf16 %v1145_v17, %v1145_v17  ;;  %s3177_s6 = sld [smem:[#allocation27_spill]] (%p1129_p1)  ;;  %s2508_s4 = smov (%p1129_p1), 8  }
 0x203   : >> { %v1152_v9 = vunpack.c.l.b16 %v1146_v6  ;;  %v1153_v13 = vunpack.c.l.b16 %v1147_v7  ;;  %v1184_v23 = vunpack.c.l.b16 %v1148_v19  ;;  %s3180_s12 = sld [smem:[#allocation29_spill]] (%p1129_p1) }
 0x204   : >> { %v1185_v25 = vunpack.c.l.b16 %v1149_v20  ;;  %s3186_s7 = sld [smem:[#allocation36_spill]] (%p1129_p1) }
 0x205   : >> { %v1154_v18 = vpack.c.b16 %v1153_v13, %v1152_v9 }
 0x206   : >> { %v1186_v26 = vpack.c.b16 %v1185_v25, %v1184_v23 }
 0x208   : > { %s3178_s29 = scalar_lea.vmem (%p1129_p1), %s3177_s6, %s2708_s26 }
 0x209   : > { %s3181_s9 = scalar_lea.vmem (%p1129_p1), %s3180_s12, %s2708_s26  ;;  %s2506_s26 = smov (%p1129_p1), [#allocation8]  }
 0x20a   : >> { %1192 = vrot.lane.b32.xlu0 %v2920_v2, %s2503_s25 }
 0x274   : >> { %v1161_v8 = vpop.permute.xlu0 %1160 }
 0x275   : >> { %v1166_v12 = vsel %vm966_vm1, %v1161_v8, 0 }
 0x276   : >> { %1175 = vmatpush.bf16.xpose.msra.mxu0 %v1166_v12 }
 0x27c   : >> { %v1193_v21 = vpop.permute.xlu0 %1192 }
 0x27d   : >> { %2024 = vmatmul.msk.bf16.vlgmr.msra.gmra.mxu0 %vm966_vm1, %v1154_v18  ;;  %v1198_v22 = vsel %vm966_vm1, %v1193_v21, 0 }
 0x27e   : >> { %1207 = vmatpush.bf16.xpose.msra.mxu1 %v1198_v22 }
 0x285   : >> { %2025 = vmatmul.msk.bf16.vlgmr.msra.gmra.mxu1 %vm966_vm1, %v1186_v26 }
 0x2fa   : >> { %v1177_v27 = vpop.f32.mrf.mxu0 }
 0x2fb   : >> { %v1215_v28 = vsel %vm1214_vm15, %v1177_v27, -inf }
 0x2fc   : >> { %1216 = vmax.xlane.f32.xlu1 %v1215_v28 }
 0x302   : >> { %v1179_v31 = vpop.f32.mrf.mxu0  ;;  %v1209_v32 = vpop.f32.mrf.mxu1 }
 0x303   : >> { %v1221_v33 = vsel %vm1214_vm15, %v1209_v32, -inf  ;;  %v1218_v34 = vsel %vm1214_vm15, %v1179_v31, -inf }
 0x304   : >> { %1222 = vmax.xlane.f32.xlu2 %v1221_v33  ;;  %1219 = vmax.xlane.f32.xlu1 %v1218_v34  ;;  %v2244_v34 = vld [vmem:[%s1139_s22] ss:$0 sm:$0xff] }
 0x30a   : >> { %v1211_v29 = vpop.f32.mrf.mxu1 }
 0x30b   : >> { %v1224_v35 = vsel %vm1214_vm15, %v1211_v29, -inf }
 0x30c   : >> { %1225 = vmax.xlane.f32.xlu2 %v1224_v35 }
 0x36f   : >> { %v1217_v36 = vpop.xlane.xlu1 %1216 }
 0x370   : >> { %v1227_v37 = vsub.f32 %v1177_v27, %v1217_v36 }
 0x372   : >> { %v1231_v38 = vmul.f32 1.442695, %v1227_v37 }
 0x374   : >> { %2245 = vpow2.f32 %v1231_v38 }
 0x377   : >> { %v1223_v30 = vpop.xlane.xlu2 %1222  ;;  %v1220_v41 = vpop.xlane.xlu1 %1219 }
 0x378   : >> { %v1229_v42 = vsub.f32 %v1209_v32, %v1223_v30  ;;  %v1228_v43 = vsub.f32 %v1179_v31, %v1220_v41 }
 0x37a   : >> { %v2246_v44 = vpop.eup %2245  ;;  %v1235_v45 = vmul.f32 1.442695, %v1229_v42  ;;  %v1233_v39 = vmul.f32 1.442695, %v1228_v43 }
 0x37b   : >> { %v1239_v46 = vsel %vm1214_vm15, %v2246_v44, 0.0 }
 0x37c   : >> { %2247 = vpow2.f32 %v1235_v45  ;;  %1240 = vadd.xlane.f32.xlu0 %v1239_v46  ;;  %v1325_v46 = vsel (%p1129_p1), %vm1323_vm0, %v2872_v54, 0.0 }
 0x37d   : >> { %2249 = vpow2.f32 %v1233_v39 }
 0x37f   : >> { %v1226_v40 = vpop.xlane.xlu2 %1225 }
 0x380   : >> { %v1230_v51 = vsub.f32 %v1211_v29, %v1226_v40  ;;  %v1333_v40 = vsel (%p1129_p1), %vm1323_vm0, %v2862_v47, 0.0 }
 0x382   : >> { %v2248_v52 = vpop.eup %2247  ;;  %v1237_v61 = vmul.f32 1.442695, %v1230_v51  ;;  %v1334_v51 = vsel (%p1129_p1), %vm1323_vm0, %v2870_v53, 0.0  ;;  %v2091_v53 = vld [vmem:[%s2738_s19 + $0x8] sm:$0xff] (%p1129_p1)  ;;  %s2507_s19 = smov (%p1129_p1), 128  }
 0x383   : >> { %v2250_v62 = vpop.eup %2249  ;;  %v1245_v0 = vsel %vm1214_vm15, %v2248_v52, 0.0  ;;  %1396 = vmatpush.bf16.msra.mxu0 (%p1129_p1), %v2091_v53 }
 0x384   : >> { %2251 = vpow2.f32 %v1237_v61  ;;  %1246 = vadd.xlane.f32.xlu2 %v1245_v0  ;;  %v1242_v1 = vsel %vm1214_vm15, %v2250_v62, 0.0  ;;  %v1335_v61 = vadd.f32 (%p1129_p1), %v1334_v51, %v1333_v40 }
 0x385   : >> { %1243 = vadd.xlane.f32.xlu1 %v1242_v1 }
 0x386   : > { %v1336_v0 = vrot.slane (%p1129_p1), %v1335_v61, 4 }
 0x387   : > { %1397 = vmatpush.bf16.msra.mxu0 (%p1129_p1), %v2090_v56 }
 0x38a   : >> { %v2252_v3 = vpop.eup %2251 }
 0x38b   : >> { %v1248_v4 = vsel %vm1214_vm15, %v2252_v3, 0.0 }
 0x38d   : >> { %1249 = vadd.xlane.f32.xlu1 %v1248_v4 }
 0x39c   : >> { %1268 = vrot.lane.b32.xlu2 %v2909_v63, %s2504_s15 }
 0x3a6   : >> { %1293 = vrot.lane.b32.xlu1 %v2920_v2, %s2504_s15 }
 0x3ef   : >> { %v1241_v5 = vpop.xlane.xlu0 %1240 }
 0x3f0   : >> { %2253 = vrcp.f32 %v1241_v5 }
 0x3f6   : >> { %v2254_v8 = vpop.eup %2253 }
 0x3f7   : >> { %v1247_v6 = vpop.xlane.xlu2 %1246  ;;  %v1255_v9 = vmul.f32 %v2254_v8, %v2246_v44 }
 0x3f8   : >> { %v1244_v7 = vpop.xlane.xlu1 %1243 }
 0x3f9   : >> { %2255 = vrcp.f32 %v1244_v7  ;;  %v1259_v17 = vpack.c.bf16 %v1255_v9, %v1255_v9 }
 0x3fb   : >> { %v1265_v20 = vunpack.c.l.b16 %v1259_v17 }
 0x3ff   : >> { %v2256_v12 = vpop.eup %2255  ;;  %v1269_v13 = vpop.permute.xlu2 %1268 }
 0x400   : >> { %1281 = vmatpush.bf16.msra.mxu2 %v1269_v13  ;;  %v1256_v16 = vmul.f32 %v2256_v12, %v2250_v62  ;;  %v1250_v18 = vpop.xlane.xlu1 %1249 }
 0x401   : >> { %2257 = vrcp.f32 %v1250_v18 }
 0x402   : >> { %v1260_v19 = vpack.c.bf16 %v1256_v16, %v1256_v16  ;;  %2259 = vrcp.f32 %v1247_v6 }
 0x404   : >> { %v1266_v21 = vunpack.c.l.b16 %v1260_v19 }
 0x406   : >> { %v1267_v63 = vpack.c.b16 %v1266_v21, %v1265_v20  ;;  %v2261_v20 = vld [vmem:[%s3178_s29] ss:$0 sm:$0xff] (%p1129_p1) }
 0x407   : >> { %v2258_v2 = vpop.eup %2257  ;;  %v2262_v21 = vld [vmem:[%s916_s13] ss:$0 sm:$0xff] (%p1129_p1) }
 0x408   : >> { %2026 = vmatmul.msk.bf16.vlgmr.msra.gmra.mxu2 %vm1214_vm15, %v1267_v63  ;;  %v2260_v22 = vpop.eup %2259  ;;  %v1258_v23 = vmul.f32 %v2258_v2, %v2252_v3  ;;  %v1337_v3 = vadd.f32 (%p1129_p1), %v1336_v0, %v1335_v61 }
 0x409   : >> { %v1257_v25 = vmul.f32 %v2260_v22, %v2248_v52 }
 0x40a   : >> { %v1262_v26 = vpack.c.bf16 %v1258_v23, %v1258_v23  ;;  %v1338_v5 = vrot.slane (%p1129_p1), %v1337_v3, 2 }
 0x40b   : >> { %v1261_v27 = vpack.c.bf16 %v1257_v25, %v1257_v25 }
 0x40c   : >> { %v1291_v28 = vunpack.c.l.b16 %v1262_v26 }
 0x40d   : >> { %v1290_v32 = vunpack.c.l.b16 %v1261_v27 }
 0x40f   : >> { %v1292_v33 = vpack.c.b16 %v1291_v28, %v1290_v32 }
 0x418   : >> { %v1294_v31 = vpop.permute.xlu1 %1293 }
 0x419   : >> { %1306 = vmatpush.bf16.msra.mxu3 %v1294_v31 }
 0x41c   : >> { %2027 = vmatmul.msk.bf16.vlgmr.msra.gmra.mxu3 %vm1214_vm15, %v1292_v33 }
 0x48b   : >> { %v1283_v29 = vpop.f32.mrf.mxu2 }
 0x48c   : >> { %v1314_v35 = vmul.f32 %v2244_v34, %v1283_v29 }
 0x48e   : >> { %v1318_v36 = vadd.f32 %v2496_v60, %v1314_v35  }
 0x490   : >> { %v3175_v60 = vmov %v1318_v36 }
 0x491   : > { %v1324_v60 = vsel (%p1129_p1), %vm1323_vm0, %v2864_v48, 0.0  ;;  %v1339_v48 = vadd.f32 (%p1129_p1), %v1338_v5, %v1337_v3 }
 0x492   : > { %v1326_v52 = vadd.f32 (%p1129_p1), %v1325_v46, %v1324_v60 }
 0x493   : >> { %v1285_v37 = vpop.f32.mrf.mxu2  ;;  %v1340_v47 = vrot.slane (%p1129_p1), %v1339_v48, 1 }
 0x494   : >> { %v1315_v38 = vmul.f32 %v2244_v34, %v1285_v37  ;;  %v1327_v62 = vrot.slane (%p1129_p1), %v1326_v52, 4 }
 0x495   : > { %v1341_v54 = vadd.f32 (%p1129_p1), %v1340_v47, %v1339_v48 }
 0x496   : >> { %v1319_v30 = vadd.f32 %v2492_v59, %v1315_v38   ;;  %v1328_v1 = vadd.f32 (%p1129_p1), %v1327_v62, %v1326_v52 }
 0x498   : >> { %v3174_v59 = vmov %v1319_v30  ;;  %v1329_v4 = vrot.slane (%p1129_p1), %v1328_v1, 2 }
 0x49a   : > { %v1330_v49 = vadd.f32 (%p1129_p1), %v1329_v4, %v1328_v1 }
 0x49c   : > { %v1331_v50 = vrot.slane (%p1129_p1), %v1330_v49, 1 }
 0x49e   : > { %v1332_v55 = vadd.f32 (%p1129_p1), %v1331_v50, %v1330_v49  ;;  %v2093_v49 = vld [vmem:[%s2755_s24 + $0x8] sm:$0xff] (%p1129_p1) }
 0x49f   : >> { %v1308_v41 = vpop.f32.mrf.mxu3  ;;  %1559 = vmatpush.bf16.msra.mxu1 (%p1129_p1), %v2093_v49  ;;  %v2101_v49 = vld [vmem:[%s2765_s10 + $0x38] sm:$0xff] (%p1129_p1) }
 0x4a0   : >> { %v1316_v42 = vmul.f32 %v2244_v34, %v1308_v41  ;;  %1344 = vrot.lane.b32.xlu0 (%p1129_p1), %v1332_v55, %s2505_s16  ;;  %v2092_v55 = vld [vmem:[%s2755_s24] sm:$0xff] (%p1129_p1)  ;;  %1678 = vmatpush.bf16.msra.mxu2 (%p1129_p1), %v2101_v49 }
 0x4a1   : > { %2104 = vmatpush.bf16.msra.mxu3 (%p1129_p1), %v2101_v49 }
 0x4a2   : >> { %v1320_v43 = vadd.f32 %v2488_v58, %v1316_v42  }
 0x4a3   : > { %1560 = vmatpush.bf16.msra.mxu1 (%p1129_p1), %v2092_v55  ;;  %v2096_v55 = vld [vmem:[%s2765_s10 + $0x10] sm:$0xff] (%p1129_p1) }
 0x4a4   : >> { %v3173_v58 = vmov %v1320_v43 }
 0x4a7   : >> { %v1310_v44 = vpop.f32.mrf.mxu3 }
 0x4a8   : >> { %v1317_v45 = vmul.f32 %v2244_v34, %v1310_v44  ;;  %1131 = sbr.rel (!%p1129_p1) target bundleno = 509 (0x1fd), region = 216  ;;  %1346 = vrot.lane.b32.xlu0 (%p1129_p1), %v1341_v54, %s2505_s16  ;;  %s3185_s16 = sld [smem:[#allocation16_spill]] (%p1129_p1) }
 0x4aa   : >> { %v1321_v39 = vadd.f32 %v2484_v57, %v1317_v45  }
 0x4ac   : >> { %v3172_v57 = vmov %v1321_v39 }
 0x4ad   : > { %v1322_v57 = vld [vmem:[%s3176_s21] sm:$0x1]  ;;  %s1724_s21 = sshll.u32 %s3186_s7, 4  ;;  %s1725_s21 = int_to_ptr.hbm [resolvable:$true] %s1724_s21 }
 0x4ae   : > { %p2133_p2 = scmp.eq.s32.totalorder %s3185_s16, 1 }
 0x512   : > { %v1345_v58 = vpop.permute.xlu0 %1344 }
 0x513   : > { %v1350_v59 = vmul.f32 %v1345_v58, %v1322_v57 }
 0x515   : > { %v1354_v6 = vperm.slane %v1350_v59, 0 }
 0x517   : > { %v1358_v7 = vadd.f32 %v1354_v6, %v1318_v36  ;;  %v1359_v8 = vadd.f32 %v1354_v6, %v1319_v30 }
 0x519   : > { %v1362_v9 = vpack.c.bf16 %v1359_v8, %v1358_v7 }
 0x51a   : > { %v1347_v12 = vpop.permute.xlu0 %1346 }
 0x51b   : > { %2036 = vmatmul.msk.bf16.vlgmr.msra.gmra.mxu0 %vm966_vm1, %v1362_v9  ;;  %v1351_v13 = vmul.f32 %v1347_v12, %v1322_v57 }
 0x51d   : > { %v1355_v16 = vperm.slane %v1351_v13, 0 }
 0x51f   : > { %v1360_v17 = vadd.f32 %v1355_v16, %v1320_v43  ;;  %v1361_v18 = vadd.f32 %v1355_v16, %v1321_v39 }
 0x521   : > { %v1363_v19 = vpack.c.bf16 %v1361_v18, %v1360_v17 }
 0x52b   : > { %2037 = vmatmul.msk.bf16.gmra.mxu0 %vm966_vm1, %v1363_v19 }
 0x598   : > { %v1399_v63 = vpop.f32.mrf.mxu0 }
 0x599   : > { %v1400_v2 = vadd.f32 %v2261_v20, %v1399_v63 }
 0x59b   : > { %v1413_v22 = vmul.f32 %v2262_v21, %v1400_v2 }
 0x59d   : > { %v2987_v23 = vadd.f32 %v1413_v22, %v2797_v11 }
 0x59f   : > { %v1423_v25 = vsel %vm966_vm1, %v2987_v23, 0.0 }
 0x5a0   : > { %v1401_v26 = vpop.f32.mrf.mxu0  ;;  %1424 = vadd.xlane.f32.xlu1 %v1423_v25 }
 0x5a1   : > { %v1402_v27 = vadd.f32 %v2261_v20, %v1401_v26 }
 0x5a3   : > { %v1414_v28 = vmul.f32 %v2262_v21, %v1402_v27  ;;  %v2263_v27 = vld [vmem:[%s3181_s9] ss:$0 sm:$0xff] }
 0x5a5   : > { %v2992_v31 = vadd.f32 %v1414_v28, %v2805_v15 }
 0x5a7   : > { %v1426_v32 = vsel %vm966_vm1, %v2992_v31, 0.0 }
 0x5a8   : > { %v1404_v33 = vpop.f32.mrf.mxu0  ;;  %1427 = vadd.xlane.f32.xlu1 %v1426_v32 }
 0x5a9   : > { %v1405_v34 = vadd.f32 %v2261_v20, %v1404_v33 }
 0x5ab   : > { %v1415_v29 = vmul.f32 %v2262_v21, %v1405_v34 }
 0x5ad   : > { %v2997_v11 = vadd.f32 %v1415_v29, %v2795_v10 }
 0x5af   : > { %v1429_v35 = vsel %vm966_vm1, %v2997_v11, 0.0 }
 0x5b0   : > { %v1406_v36 = vpop.f32.mrf.mxu0  ;;  %1430 = vadd.xlane.f32.xlu2 %v1429_v35  ;;  %v2264_v35 = vld [vmem:[%s764_s27] ss:$0 sm:$0xff] }
 0x5b1   : > { %v1407_v37 = vadd.f32 %v2261_v20, %v1406_v36 }
 0x5b3   : > { %v1416_v38 = vmul.f32 %v2262_v21, %v1407_v37 }
 0x5b5   : > { %v3002_v15 = vadd.f32 %v1416_v38, %v2803_v14 }
 0x5b7   : > { %v1432_v30 = vsel %vm966_vm1, %v3002_v15, 0.0 }
 0x5b8   : > { %1433 = vadd.xlane.f32.xlu2 %v1432_v30 }
 0x613   : > { %v1425_v41 = vpop.xlane.xlu1 %1424 }
 0x614   : > { %v1435_v42 = vmul.f32 %v1425_v41, %v2811_v24 }
 0x616   : > { %v1439_v10 = vsub.f32 %v2987_v23, %v1435_v42 }
 0x618   : > { %v1443_v43 = vmul.f32 %v1439_v10, %v1439_v10 }
 0x61a   : > { %v1447_v44 = vsel %vm966_vm1, %v1443_v43, 0.0 }
 0x61b   : > { %1448 = vadd.xlane.f32.xlu0 %v1447_v44  ;;  %v1428_v45 = vpop.xlane.xlu1 %1427 }
 0x61c   : > { %v1436_v39 = vmul.f32 %v1428_v45, %v2811_v24 }
 0x61e   : > { %v1440_v60 = vsub.f32 %v2992_v31, %v1436_v39 }
 0x620   : > { %v1444_v14 = vmul.f32 %v1440_v60, %v1440_v60 }
 0x622   : > { %v1450_v46 = vsel %vm966_vm1, %v1444_v14, 0.0 }
 0x623   : > { %v1431_v40 = vpop.xlane.xlu2 %1430  ;;  %1451 = vadd.xlane.f32.xlu1 %v1450_v46 }
 0x624   : > { %v1437_v51 = vmul.f32 %v1431_v40, %v2811_v24 }
 0x626   : > { %v3014_v52 = vsub.f32 %v2997_v11, %v1437_v51 }
 0x628   : > { %v1445_v61 = vmul.f32 %v3014_v52, %v3014_v52 }
 0x62a   : > { %v1453_v62 = vsel %vm966_vm1, %v1445_v61, 0.0 }
 0x62b   : > { %1454 = vadd.xlane.f32.xlu2 %v1453_v62  ;;  %v1434_v0 = vpop.xlane.xlu2 %1433 }
 0x62c   : > { %v1438_v1 = vmul.f32 %v1434_v0, %v2811_v24 }
 0x62e   : > { %v3021_v3 = vsub.f32 %v3002_v15, %v1438_v1 }
 0x630   : > { %v1446_v4 = vmul.f32 %v3021_v3, %v3021_v3 }
 0x632   : > { %v1456_v5 = vsel %vm966_vm1, %v1446_v4, 0.0 }
 0x633   : > { %1457 = vadd.xlane.f32.xlu1 %v1456_v5 }
 0x68e   : > { %v1449_v50 = vpop.xlane.xlu0 %1448 }
 0x68f   : > { %v1459_v48 = vmul.f32 %v1449_v50, %v2811_v24  ;;  %v2099_v50 = vld [vmem:[%s2765_s10 + $0x28] sm:$0xff] }
 0x691   : > { %v1463_v47 = vadd.f32 1e-06, %v1459_v48  ;;  %v2097_v48 = vld [vmem:[%s2765_s10 + $0x18] sm:$0xff] }
 0x693   : > { %2268 = vrsqrt.f32 %v1463_v47  ;;  %vm1473_vm3 = vweird.f32 %v1463_v47 }
 0x696   : > { %v1452_v54 = vpop.xlane.xlu1 %1451 }
 0x697   : > { %v1460_v53 = vmul.f32 %v1452_v54, %v2811_v24  ;;  %v2094_v54 = vld [vmem:[%s2765_s10] sm:$0xff] }
 0x699   : > { %v2269_v56 = vpop.eup %2268  ;;  %v1464_v57 = vadd.f32 1e-06, %v1460_v53  ;;  %v2265_v53 = vld [vmem:[%s927_s30] ss:$0 sm:$0xff] }
 0x69a   : > { %v1468_v58 = vmul.f32 %v2269_v56, %v1463_v47  ;;  %vm1474_vm2 = vweird.f32 %v2269_v56  ;;  %v2095_v47 = vld [vmem:[%s2765_s10 + $0x8] sm:$0xff] }
 0x69b   : > { %2270 = vrsqrt.f32 %v1464_v57  ;;  %vm1475_vm4 = vmor %vm1473_vm3, %vm1474_vm2  ;;  %vm1483_vm6 = vweird.f32 %v1464_v57 }
 0x69c   : > { %v1469_v59 = vmul.f32 %v2269_v56, %v1468_v58 }
 0x69e   : > { %v1470_v6 = vmul.f32 0.5, %v1469_v59  ;;  %v1455_v7 = vpop.xlane.xlu2 %1454 }
 0x69f   : > { %v1461_v8 = vmul.f32 %v1455_v7, %v2811_v24 }
 0x6a0   : > { %v1471_v9 = vsub.f32 1.5, %v1470_v6 }
 0x6a1   : > { %v2271_v12 = vpop.eup %2270  ;;  %v1465_v13 = vadd.f32 1e-06, %v1461_v8 }
 0x6a2   : > { %v1472_v16 = vmul.f32 %v2269_v56, %v1471_v9  ;;  %v1478_v17 = vmul.f32 %v2271_v12, %v1464_v57  ;;  %vm1484_vm5 = vweird.f32 %v2271_v12 }
 0x6a3   : > { %2272 = vrsqrt.f32 %v1465_v13  ;;  %vm1485_vm7 = vmor %vm1483_vm6, %vm1484_vm5  ;;  %vm1493_vm9 = vweird.f32 %v1465_v13 }
 0x6a4   : > { %v1479_v18 = vmul.f32 %v2271_v12, %v1478_v17  ;;  %v1476_v19 = vsel %vm1475_vm4, %v2269_v56, %v1472_v16 }
 0x6a5   : > { %v1507_v26 = vmul.f32 %v1476_v19, %v1439_v10 }
 0x6a6   : > { %v1480_v20 = vmul.f32 0.5, %v1479_v18  ;;  %v1458_v21 = vpop.xlane.xlu1 %1457 }
 0x6a7   : > { %v1462_v63 = vmul.f32 %v1458_v21, %v2811_v24  ;;  %v1514_v24 = vmul.f32 %v2263_v27, %v1507_v26 }
 0x6a8   : > { %v1481_v2 = vsub.f32 1.5, %v1480_v20 }
 0x6a9   : > { %v2273_v22 = vpop.eup %2272  ;;  %v1466_v25 = vadd.f32 1e-06, %v1462_v63  ;;  %v1521_v41 = vadd.f32 %v2264_v35, %v1514_v24 }
 0x6aa   : > { %v1482_v28 = vmul.f32 %v2271_v12, %v1481_v2  ;;  %v1488_v32 = vmul.f32 %v2273_v22, %v1465_v13  ;;  %vm1494_vm8 = vweird.f32 %v2273_v22 }
 0x6ab   : > { %2274 = vrsqrt.f32 %v1466_v25  ;;  %vm1495_vm10 = vmor %vm1493_vm9, %vm1494_vm8  ;;  %vm1503_vm12 = vweird.f32 %v1466_v25 }
 0x6ac   : > { %v1489_v33 = vmul.f32 %v2273_v22, %v1488_v32  ;;  %v1486_v34 = vsel %vm1485_vm7, %v2271_v12, %v1482_v28 }
 0x6ad   : > { %v1508_v29 = vmul.f32 %v1486_v34, %v1440_v60 }
 0x6ae   : > { %v1490_v36 = vmul.f32 0.5, %v1489_v33 }
 0x6af   : > { %v1515_v37 = vmul.f32 %v2263_v27, %v1508_v29 }
 0x6b0   : > { %v1491_v38 = vsub.f32 1.5, %v1490_v36 }
 0x6b1   : > { %v2275_v30 = vpop.eup %2274  ;;  %v1522_v42 = vadd.f32 %v2264_v35, %v1515_v37 }
 0x6b2   : > { %v1492_v10 = vmul.f32 %v2273_v22, %v1491_v38  ;;  %v1498_v43 = vmul.f32 %v2275_v30, %v1466_v25  ;;  %vm1504_vm11 = vweird.f32 %v2275_v30 }
 0x6b3   : > { %v1525_v44 = vpack.c.bf16 %v1522_v42, %v1521_v41  ;;  %vm1505_vm13 = vmor %vm1503_vm12, %vm1504_vm11 }
 0x6b4   : > { %v1499_v45 = vmul.f32 %v2275_v30, %v1498_v43  ;;  %v1496_v39 = vsel %vm1495_vm10, %v2273_v22, %v1492_v10 }
 0x6b5   : > { %2046 = vmatmul.msk.bf16.vlgmr.msra.gmra.mxu1 %vm966_vm1, %v1525_v44  ;;  %v1509_v46 = vmul.f32 %v1496_v39, %v3014_v52  ;;  %v2100_v52 = vld [vmem:[%s2765_s10 + $0x30] sm:$0xff] }
 0x6b6   : > { %v1500_v60 = vmul.f32 0.5, %v1499_v45  ;;  %1679 = vmatpush.bf16.msra.mxu2 %v2100_v52  ;;  %2105 = vmatpush.bf16.msra.mxu3 %v2100_v52 }
 0x6b7   : > { %v1516_v62 = vmul.f32 %v2263_v27, %v1509_v46 }
 0x6b8   : > { %v1501_v14 = vsub.f32 1.5, %v1500_v60 }
 0x6b9   : > { %v1523_v1 = vadd.f32 %v2264_v35, %v1516_v62  ;;  %v2266_v62 = vld [vmem:[%s935_s17] ss:$0 sm:$0xff]  ;;  %s1722_s17 = sshll.u32 %s2506_s26, 4  ;;  %s1723_s17 = int_to_ptr.vmem [resolvable:$true] %s1722_s17 }
 0x6ba   : > { %v1502_v40 = vmul.f32 %v2275_v30, %v1501_v14  ;;  %1680 = vmatpush.bf16.msra.mxu2 %v2099_v50  ;;  %2106 = vmatpush.bf16.msra.mxu3 %v2099_v50 }
 0x6bc   : > { %v1506_v51 = vsel %vm1505_vm13, %v2275_v30, %v1502_v40 }
 0x6bd   : > { %v1510_v61 = vmul.f32 %v1506_v51, %v3021_v3  ;;  %v2098_v3 = vld [vmem:[%s2765_s10 + $0x20] sm:$0xff] }
 0x6be   : > { %1681 = vmatpush.bf16.msra.mxu2 %v2098_v3  ;;  %2107 = vmatpush.bf16.msra.mxu3 %v2098_v3 }
 0x6bf   : > { %v1517_v0 = vmul.f32 %v2263_v27, %v1510_v61 }
 0x6c1   : > { %v1524_v4 = vadd.f32 %v2264_v35, %v1517_v0  ;;  %v2267_v0 = vld [vmem:[%s938_s1] ss:$0 sm:$0xff] }
 0x6c2   : > { %1682 = vmatpush.bf16.msra.mxu2 %v2097_v48  ;;  %2108 = vmatpush.bf16.msra.mxu3 %v2097_v48 }
 0x6c3   : > { %v1526_v5 = vpack.c.bf16 %v1524_v4, %v1523_v1 }
 0x6c5   : > { %2047 = vmatmul.msk.bf16.gmra.mxu1 %vm966_vm1, %v1526_v5 }
 0x6c6   : > { %1683 = vmatpush.bf16.msra.mxu2 %v2096_v55  ;;  %2109 = vmatpush.bf16.msra.mxu3 %v2096_v55 }
 0x6ca   : > { %1684 = vmatpush.bf16.msra.mxu2 %v2095_v47  ;;  %2110 = vmatpush.bf16.msra.mxu3 %v2095_v47 }
 0x6ce   : > { %1685 = vmatpush.bf16.msra.mxu2 %v2094_v54  ;;  %2111 = vmatpush.bf16.msra.mxu3 %v2094_v54 }
 0x732   : > { %v1562_v56 = vpop.f32.mrf.mxu1 }
 0x733   : > { %v1563_v57 = vadd.f32 %v2265_v53, %v1562_v56 }
 0x735   : > { %v1576_v58 = vmul.f32 0.044715, %v1563_v57  ;;  %v1572_v29 = vmul.f32 0.5, %v1563_v57 }
 0x737   : > { %v1580_v59 = vmul.f32 %v1576_v58, %v1563_v57 }
 0x739   : > { %v1584_v6 = vmul.f32 %v1580_v59, %v1563_v57 }
 0x73a   : > { %v1564_v7 = vpop.f32.mrf.mxu1 }
 0x73b   : > { %v1565_v8 = vadd.f32 %v2265_v53, %v1564_v7  ;;  %v1588_v9 = vadd.f32 %v1584_v6, %v1563_v57 }
 0x73d   : > { %v1577_v12 = vmul.f32 0.044715, %v1565_v8  ;;  %v1592_v16 = vmul.f32 0.7978846, %v1588_v9  ;;  %v1573_v24 = vmul.f32 0.5, %v1565_v8 }
 0x73f   : > { %v1581_v13 = vmul.f32 %v1577_v12, %v1565_v8  ;;  %2276 = vtanh.f32 %v1592_v16 }
 0x741   : > { %v1585_v17 = vmul.f32 %v1581_v13, %v1565_v8 }
 0x742   : > { %v1567_v18 = vpop.f32.mrf.mxu1 }
 0x743   : > { %v1568_v19 = vadd.f32 %v2265_v53, %v1567_v18  ;;  %v1589_v20 = vadd.f32 %v1585_v17, %v1565_v8 }
 0x745   : > { %v1578_v21 = vmul.f32 0.044715, %v1568_v19  ;;  %v1593_v63 = vmul.f32 0.7978846, %v1589_v20  ;;  %v2277_v22 = vpop.eup %2276  ;;  %v1574_v60 = vmul.f32 0.5, %v1568_v19 }
 0x746   : > { %v1600_v32 = vadd.f32 1.0, %v2277_v22 }
 0x747   : > { %2278 = vtanh.f32 %v1593_v63  ;;  %v1582_v2 = vmul.f32 %v1578_v21, %v1568_v19 }
 0x748   : > { %v1604_v38 = vmul.f32 %v1600_v32, %v1572_v29 }
 0x749   : > { %v1586_v25 = vmul.f32 %v1582_v2, %v1568_v19 }
 0x74a   : > { %v1569_v26 = vpop.f32.mrf.mxu1 }
 0x74b   : > { %v1570_v27 = vadd.f32 %v2265_v53, %v1569_v26  ;;  %v1590_v28 = vadd.f32 %v1586_v25, %v1568_v19 }
 0x74d   : > { %v2279_v33 = vpop.eup %2278  ;;  %v1579_v34 = vmul.f32 0.044715, %v1570_v27  ;;  %v1594_v37 = vmul.f32 0.7978846, %v1590_v28  ;;  %v1575_v14 = vmul.f32 0.5, %v1570_v27 }
 0x74e   : > { %v1601_v35 = vadd.f32 1.0, %v2279_v33 }
 0x74f   : > { %v1583_v36 = vmul.f32 %v1579_v34, %v1570_v27  ;;  %2280 = vtanh.f32 %v1594_v37 }
 0x750   : > { %v1605_v30 = vmul.f32 %v1601_v35, %v1573_v24 }
 0x751   : > { %v1587_v41 = vmul.f32 %v1583_v36, %v1570_v27 }
 0x752   : > { %v1608_v42 = vpack.c.bf16 %v1605_v30, %v1604_v38 }
 0x753   : > { %v1591_v10 = vadd.f32 %v1587_v41, %v1570_v27 }
 0x754   : > { %1686 = vmatmul.bf16.vlgmr.msra.gmra.mxu2 %v1608_v42 }
 0x755   : > { %v1595_v43 = vmul.f32 0.7978846, %v1591_v10  ;;  %v2281_v44 = vpop.eup %2280 }
 0x756   : > { %v1602_v45 = vadd.f32 1.0, %v2281_v44 }
 0x757   : > { %2282 = vtanh.f32 %v1595_v43 }
 0x758   : > { %v1606_v40 = vmul.f32 %v1602_v45, %v1574_v60 }
 0x75d   : > { %v2283_v39 = vpop.eup %2282 }
 0x75e   : > { %v1603_v46 = vadd.f32 1.0, %v2283_v39 }
 0x760   : > { %v1607_v51 = vmul.f32 %v1603_v46, %v1575_v14 }
 0x762   : > { %v1609_v61 = vpack.c.bf16 %v1607_v51, %v1606_v40 }
 0x764   : > { %1691 = vmatmul.bf16.vlgmr.msra.gmra.mxu3 %v1609_v61 }
 0x7d7   : > { %v1687_v1 = vpop.f32.mrf.mxu2 }
 0x7d8   : > { %v1688_v4 = vadd.f32 %v2266_v62, %v1687_v1 }
 0x7da   : > { %v1701_v5 = vmul.f32 %v2267_v0, %v1688_v4 }
 0x7dc   : > { %v1705_v49 = vadd.f32 %v1701_v5, %v2987_v23 }
 0x7de   : > { %1709 = vst.msk [vmem:[#allocation8] sm:$0xff] %vm966_vm1, %v1705_v49 }
 0x7df   : > { %v1689_v52 = vpop.f32.mrf.mxu2 }
 0x7e0   : > { %v1690_v50 = vadd.f32 %v2266_v62, %v1689_v52 }
 0x7e2   : > { %v1702_v3 = vmul.f32 %v2267_v0, %v1690_v50 }
 0x7e4   : > { %v1706_v48 = vadd.f32 %v1702_v3, %v2992_v31 }
 0x7e6   : > { %1710 = vst.msk [vmem:[#allocation8 + $0x8] sm:$0xff] %vm966_vm1, %v1706_v48 }
 0x7e7   : > { %v1692_v55 = vpop.f32.mrf.mxu3 }
 0x7e8   : > { %v1693_v47 = vadd.f32 %v2266_v62, %v1692_v55 }
 0x7ea   : > { %v1703_v54 = vmul.f32 %v2267_v0, %v1693_v47 }
 0x7ec   : > { %v1707_v53 = vadd.f32 %v1703_v54, %v2997_v11 }
 0x7ee   : > { %1711 = vst.msk [vmem:[#allocation8 + $0x10] sm:$0xff] %vm966_vm1, %v1707_v53 }
 0x7ef   : > { %v1694_v56 = vpop.f32.mrf.mxu3 }
 0x7f0   : > { %v1695_v57 = vadd.f32 %v2266_v62, %v1694_v56 }
 0x7f2   : > { %v1704_v23 = vmul.f32 %v2267_v0, %v1695_v57 }
 0x7f4   : > { %v1708_v31 = vadd.f32 %v1704_v23, %v3002_v15 }
 0x7f6   : > { %1712 = vst.msk [vmem:[#allocation8 + $0x18] sm:$0xff] %vm966_vm1, %v1708_v31 }
 0x7f7   : > { %2119 = dma.vmem_to_hbm [thread:$0]  (%p2133_p2), %s1723_s17, 512, %s1725_s21, [#allocation4], %s2507_s19, %s2507_s19, %s2508_s4  }
 0x7f8   : > { %2455 = dma.done.wait (%p2133_p2), [#allocation4], 512  }
 0x7f9   : > { %2457 = vsyncadd (%p2133_p2), [#allocation4], 4294966784 }
 0x7fa PF: > { %s3187_s6 = sld [smem:[#allocation15_spill]] }
 0x7fb   : > { %s3188_s0 = sld [smem:[#allocation12_spill]] }
 0x7fc   : > { %s3189_s30 = sld [smem:[#allocation13_spill]] }
 0x7fd   : > { %s3190_s20 = sld [smem:[#allocation18_spill]] }
 0x7fe   : > { %s3191_s21 = sld [smem:[#allocation14_spill]] }
 0x7ff   : > { %s3192_s1 = sld [smem:[#allocation17_spill]] }
 0x800   : > { %s36_s22 = sadd.s32 1, %s3187_s6  }
 0x801   : > { %p33_p3 = scmp.ge.s32.totalorder %s36_s22, 4  }
 0x803   :  { %35 = sbr.rel (!%p33_p3) target bundleno = 26 (0x1a), region = 227 }
 0x808   :  { %1741 = vsyncpa [#allocation3], 1 }
 0x809   :  { %1743 = vsyncpa [#allocation3 + $0x1], 1 }
 0x80a   :  { %1744 = vsyncpa [#allocation6], 1 }
 0x80b   :  { %1746 = vsyncpa [#allocation6 + $0x1], 1 }
 0x80c   :  { %1747 = vsyncpa [#allocation4], 1 }
 0x80d   :  { %1749 = vsyncpa [#allocation4 + $0x1], 1 }

</bundles_post_ra>
